<compile_context>
chip_gen: v5e
topology: v5e:2x2
jax: 0.10.0
libtpu: 0.0.40
codegen_flags: <defaults>
</compile_context>

<pallas_src>
import numpy as np

import jax
import jax.numpy as jnp
from jax import lax
from jax.experimental import pallas as pl
from jax.experimental.pallas import tpu as pltpu


def _round_up(x, m):
    return ((x + m - 1) // m) * m


def _softplus_beta(x, beta=100.0, threshold=20.0):
    """torch.nn.Softplus(beta=100): x if beta*x > threshold else log1p(exp(beta*x))/beta."""
    bx = beta * x
    safe = jnp.minimum(bx, threshold)          # avoid overflow in untaken branch
    return jnp.where(bx > threshold, x, jnp.log1p(jnp.exp(safe)) / beta)


# --------------------------------------------------------------------------- #
# Kernel
# --------------------------------------------------------------------------- #
def _make_posenc_mlp_kernel(num_linear, last_layer_vpu):
    """Fused PosProj + FourierFeat + MLP kernel body."""

    def kernel(coords_ref, spread_ref, *rest):
        *wb_refs, out_ref = rest
        f32 = jnp.float32
        bf16 = jnp.bfloat16

        # Encoding: one lane-dense bf16 matmul produces every phase; the cos
        # columns already carry a +pi/2 offset (via the constant-1 pad column),
        # so a single sin covers both sin and cos.
        coords = coords_ref[...].astype(bf16)                      # (TM, KD)
        phase = jnp.dot(coords, spread_ref[...],
                        preferred_element_type=f32)                # (TM, enc)
        h = jnp.sin(phase)

        # Hidden layers: bf16 MXU matmuls, f32 accumulation, f32 softplus.
        for l in range(num_linear - 1):
            w_ref = wb_refs[2 * l]
            b_ref = wb_refs[2 * l + 1]
            h = jnp.dot(h.astype(bf16), w_ref[...],
                        preferred_element_type=f32) + b_ref[...]
            h = _softplus_beta(h)

        # Output layer (no activation).
        w_ref = wb_refs[2 * (num_linear - 1)]
        b_ref = wb_refs[2 * (num_linear - 1) + 1]
        if last_layer_vpu:
            # (hidden -> 1): VPU multiply + cross-lane reduce; MXU stays free.
            out = jnp.sum(h * w_ref[...], axis=-1, keepdims=True) + b_ref[...]
        else:
            out = jnp.dot(h.astype(bf16), w_ref[...],
                          preferred_element_type=f32) + b_ref[...]
        out_ref[...] = out.astype(out_ref.dtype)

    return kernel


# --------------------------------------------------------------------------- #
# Parameter construction (mirrors the PyTorch module's initializers)
# --------------------------------------------------------------------------- #
def init_posenc_mlp(key, *, in_features=3, out_features=1, num_hidden_layers=3,
                    hidden_features=256, projs=16, num_frequencies=4):
    assert projs > in_features
    num_linear = num_hidden_layers + 2
    keys = jax.random.split(key, 1 + num_linear)

    # PosProj buffer: randn, column-normalized (reset_parameters).
    channel = projs - in_features
    proj = jax.random.normal(keys[0], (in_features, channel), jnp.float32)
    scale = jnp.linalg.norm(proj, axis=0, keepdims=True) * (in_features ** 0.5)
    proj = proj / (1e-6 + scale)

    # Identity-augmented PosProj weight: coords @ [I | proj] == concat([coords, coords@proj]).
    w_aug = np.concatenate(
        [np.eye(in_features, dtype=np.float32), np.asarray(proj)], axis=1)  # (in, projs)

    # Fold FourierFeat's frequency fan-out into the same weight ("spread").
    # Column j*2F + t carries w_aug[:, j] * 2**(t % F).  Row `in_features`
    # (fed by a constant-1 coords column) holds pi/2 for cos columns so that
    # sin(phase) == cos on those columns (torch's interleaved layout).
    F = num_frequencies
    enc_dim = 2 * F * projs
    kd = _round_up(in_features + 1, 8)             # room for the "ones" column
    spread = np.zeros((kd, enc_dim), np.float32)
    for j in range(projs):
        for t in range(2 * F):
            col = j * 2 * F + t
            spread[:in_features, col] = w_aug[:, j] * float(2 ** (t % F))
            if t >= F:                              # cos column -> +pi/2 offset
                spread[in_features, col] = np.pi / 2.0

    # MLP linears: torch nn.Linear default init U(-1/sqrt(fan_in), 1/sqrt(fan_in)),
    # stored transposed as (fan_in, fan_out) for row-major x @ W.
    dims = [enc_dim] + [hidden_features] * (num_hidden_layers + 1) + [out_features]
    ws, bs = [], []
    for l in range(num_linear):
        kw, kb = jax.random.split(keys[1 + l])
        fan_in, fan_out = dims[l], dims[l + 1]
        bound = 1.0 / float(np.sqrt(fan_in))
        ws.append(jax.random.uniform(kw, (fan_in, fan_out), jnp.float32, -bound, bound))
        bs.append(jax.random.uniform(kb, (1, fan_out), jnp.float32, -bound, bound))

    return dict(proj=proj, spread=jnp.asarray(spread), ws=ws, bs=bs,
                in_features=in_features)


# --------------------------------------------------------------------------- #
# Wrapper
# --------------------------------------------------------------------------- #
def posenc_mlp_forward(coords, params, *, num_frequencies, tile_m=4096):
    """coords: (B, N, in_features) -> (B, N, out_features)."""
    del num_frequencies  # folded into the spread matrix
    B, N, in_dim = coords.shape
    spread = params["spread"]                      # (KD, enc_dim) f32
    ws, bs = params["ws"], params["bs"]
    kd, enc_dim = spread.shape
    out_features = ws[-1].shape[1]
    num_linear = len(ws)

    M = B * N
    tm = min(tile_m, _round_up(M, 8))              # tile rows (multiple of 8)
    Mp = _round_up(M, tm)                          # pad M to a whole number of tiles

    # Pad rows with zeros; pad the feature dim with a constant-1 column (drives
    # the +pi/2 cos phase offset) followed by zeros up to kd.
    coords2d = coords.reshape(M, in_dim).astype(jnp.float32)
    coords2d = jnp.pad(coords2d, ((0, Mp - M), (0, 0)))
    ones_col = jnp.ones((Mp, 1), jnp.float32)
    zero_cols = jnp.zeros((Mp, kd - in_dim - 1), jnp.float32)
    coords2d = jnp.concatenate([coords2d, ones_col, zero_cols], axis=1)  # (Mp, kd)

    grid = (Mp // tm,)
    last_layer_vpu = (out_features == 1)

    # Weights: full-array blocks with constant index_map -> fetched once into
    # VMEM, resident across grid steps.  MXU-feeding weights in bf16.
    weight_args = [spread.astype(jnp.bfloat16)]
    weight_specs = [pl.BlockSpec(spread.shape, lambda i: (0, 0))]
    for l in range(num_linear):
        w, b = ws[l], bs[l]
        if l == num_linear - 1 and last_layer_vpu:
            w_arg = w.T.astype(jnp.float32)        # (1, hidden): lane-dense, VPU path
        else:
            w_arg = w.astype(jnp.bfloat16)
        b_arg = b.astype(jnp.float32)
        weight_args += [w_arg, b_arg]
        weight_specs += [pl.BlockSpec(w_arg.shape, lambda i: (0, 0)),
                         pl.BlockSpec(b_arg.shape, lambda i: (0, 0))]

    matmul_terms = kd * enc_dim + sum(w.shape[0] * w.shape[1] for w in ws)
    flops = int(2 * Mp * matmul_terms)
    transcendentals = int(Mp * (enc_dim + 2 * sum(w.shape[1] for w in ws[:-1])))
    bytes_accessed = int(4 * Mp * (kd + out_features)
                         + sum(int(a.size) * a.dtype.itemsize for a in weight_args))

    kernel = _make_posenc_mlp_kernel(num_linear, last_layer_vpu)

    out2d = pl.pallas_call(
        kernel,
        out_shape=jax.ShapeDtypeStruct((Mp, out_features), jnp.float32),
        grid=grid,
        in_specs=[pl.BlockSpec((tm, kd), lambda i: (i, 0))] + weight_specs,
        out_specs=pl.BlockSpec((tm, out_features), lambda i: (i, 0)),
        compiler_params=pltpu.CompilerParams(
            dimension_semantics=("parallel",),
            vmem_limit_bytes=64 * 1024 * 1024),
        cost_estimate=pl.CostEstimate(
            flops=flops, transcendentals=transcendentals,
            bytes_accessed=bytes_accessed),
    )(coords2d, *weight_args)

    return out2d[:M].reshape(B, N, out_features)


# --------------------------------------------------------------------------- #
# Pure-JAX reference of the PyTorch forward (PosProj -> FourierFeat -> MLP)
# --------------------------------------------------------------------------- #
def ref_posenc_mlp(coords, proj, ws, bs, num_frequencies):
    B, N, in_dim = coords.shape
    # PosProj
    p = jnp.dot(coords.reshape(-1, in_dim), proj,
                precision=lax.Precision.HIGHEST).reshape(B, N, -1)
    cp = jnp.concatenate([coords, p], axis=-1)
    # FourierFeat
    mul = jnp.asarray([2.0 ** i for i in range(num_frequencies)], jnp.float32)
    pe = cp[..., None] * mul
    pe = jnp.concatenate([jnp.sin(pe), jnp.cos(pe)], axis=-1)
    h = pe.reshape(B, N, -1)
    # MLP
    n = len(ws)
    for l in range(n):
        h = jnp.dot(h, ws[l], precision=lax.Precision.HIGHEST) + bs[l][0]
        if l < n - 1:
            h = _softplus_beta(h)
    return h


if __name__ == "__main__":
    key = jax.random.PRNGKey(0)
    k_param, k_coords = jax.random.split(key)

    # Small shapes consistent with PosEncMLP defaults (+ projs enabled so the
    # PosProj path is exercised): 3-D coords, 16-wide projection, 4 frequencies
    # -> 128-wide Fourier encoding, hidden=256, scalar output.
    B, N = 2, 8
    in_features, out_features = 3, 1
    projs = 16
    num_frequencies = 4
    hidden_features = 256
    num_hidden_layers = 3

    params = init_posenc_mlp(
        k_param, in_features=in_features, out_features=out_features,
        num_hidden_layers=num_hidden_layers, hidden_features=hidden_features,
        projs=projs, num_frequencies=num_frequencies)

    coords = jax.random.normal(k_coords, (B, N, in_features), dtype=jnp.float32)

    out = posenc_mlp_forward(coords, params, num_frequencies=num_frequencies)
    out = jax.block_until_ready(out)

    ref = ref_posenc_mlp(coords, params["proj"], params["ws"], params["bs"],
                         num_frequencies)

    assert out.shape == (B, N, out_features)
    err = float(jnp.max(jnp.abs(out - ref)))
    # bf16 matmul inputs (f32 accumulation) -> looser tolerance than f32-HIGHEST.
    assert jnp.allclose(out, ref, atol=5e-2, rtol=5e-2), f"max abs err = {err}"

    print("KERNEL_OK")
</pallas_src>

<mosaic_0001>
module attributes {stable_mosaic.version = 11 : i64} {
  func.func @kernel(%arg0: i32, %arg1: memref<16x8xf32, #tpu.memory_space<vmem>>, %arg2: memref<8x128xbf16, #tpu.memory_space<vmem>>, %arg3: memref<128x256xbf16, #tpu.memory_space<vmem>>, %arg4: memref<1x256xf32, #tpu.memory_space<vmem>>, %arg5: memref<256x256xbf16, #tpu.memory_space<vmem>>, %arg6: memref<1x256xf32, #tpu.memory_space<vmem>>, %arg7: memref<256x256xbf16, #tpu.memory_space<vmem>>, %arg8: memref<1x256xf32, #tpu.memory_space<vmem>>, %arg9: memref<256x256xbf16, #tpu.memory_space<vmem>>, %arg10: memref<1x256xf32, #tpu.memory_space<vmem>>, %arg11: memref<1x256xf32, #tpu.memory_space<vmem>>, %arg12: memref<1x1xf32, #tpu.memory_space<vmem>>, %arg13: memref<16x1xf32, #tpu.memory_space<vmem>>) attributes {dimension_semantics = [#tpu.dimension_semantics<parallel>], iteration_bounds = array<i64: 1>, scalar_prefetch = 0 : i64, scratch_operands = 0 : i64, tpu.core_type = #tpu.core_type<tc>, window_params = [{transform_indices = @transform_0, window_bounds = array<i64: 16, 8>}, {pipeline_mode = #tpu.pipeline_mode<synchronous>, transform_indices = @transform_1, window_bounds = array<i64: 8, 128>}, {pipeline_mode = #tpu.pipeline_mode<synchronous>, transform_indices = @transform_2, window_bounds = array<i64: 128, 256>}, {pipeline_mode = #tpu.pipeline_mode<synchronous>, transform_indices = @transform_3, window_bounds = array<i64: 1, 256>}, {pipeline_mode = #tpu.pipeline_mode<synchronous>, transform_indices = @transform_4, window_bounds = array<i64: 256, 256>}, {pipeline_mode = #tpu.pipeline_mode<synchronous>, transform_indices = @transform_5, window_bounds = array<i64: 1, 256>}, {pipeline_mode = #tpu.pipeline_mode<synchronous>, transform_indices = @transform_6, window_bounds = array<i64: 256, 256>}, {pipeline_mode = #tpu.pipeline_mode<synchronous>, transform_indices = @transform_7, window_bounds = array<i64: 1, 256>}, {pipeline_mode = #tpu.pipeline_mode<synchronous>, transform_indices = @transform_8, window_bounds = array<i64: 256, 256>}, {pipeline_mode = #tpu.pipeline_mode<synchronous>, transform_indices = @transform_9, window_bounds = array<i64: 1, 256>}, {pipeline_mode = #tpu.pipeline_mode<synchronous>, transform_indices = @transform_10, window_bounds = array<i64: 1, 256>}, {pipeline_mode = #tpu.pipeline_mode<synchronous>, transform_indices = @transform_11, window_bounds = array<i64: 1, 1>}, {transform_indices = @transform_12, window_bounds = array<i64: 16, 1>}]} {
    %c0 = arith.constant 0 : index
    %c0_0 = arith.constant 0 : index
    %0 = vector.load %arg1[%c0, %c0_0] : memref<16x8xf32, #tpu.memory_space<vmem>>, vector<16x8xf32>
    %1 = arith.truncf %0 : vector<16x8xf32> to vector<16x8xbf16>
    %c0_1 = arith.constant 0 : index
    %c0_2 = arith.constant 0 : index
    %2 = vector.load %arg2[%c0_1, %c0_2] : memref<8x128xbf16, #tpu.memory_space<vmem>>, vector<8x128xbf16>
    %cst = arith.constant dense<0.000000e+00> : vector<16x128xf32>
    %3 = tpu.matmul %1, %2, %cst {dimension_numbers = #tpu.dot_dimension_numbers<[1], [0], [0], [1], [0, 0, 1, 1], [], []>} : vector<16x8xbf16>, vector<8x128xbf16>, vector<16x128xf32> -> vector<16x128xf32>
    %4 = math.sin %3 : vector<16x128xf32>
    %5 = arith.truncf %4 : vector<16x128xf32> to vector<16x128xbf16>
    %c0_3 = arith.constant 0 : index
    %c0_4 = arith.constant 0 : index
    %6 = vector.load %arg3[%c0_3, %c0_4] : memref<128x256xbf16, #tpu.memory_space<vmem>>, vector<128x256xbf16>
    %cst_5 = arith.constant dense<0.000000e+00> : vector<16x256xf32>
    %7 = tpu.matmul %5, %6, %cst_5 {dimension_numbers = #tpu.dot_dimension_numbers<[1], [0], [0], [1], [0, 0, 1, 1], [], []>} : vector<16x128xbf16>, vector<128x256xbf16>, vector<16x256xf32> -> vector<16x256xf32>
    %c0_6 = arith.constant 0 : index
    %c0_7 = arith.constant 0 : index
    %8 = vector.load %arg4[%c0_6, %c0_7] : memref<1x256xf32, #tpu.memory_space<vmem>>, vector<1x256xf32>
    %9 = vector.broadcast %8 : vector<1x256xf32> to vector<16x256xf32>
    %10 = arith.addf %7, %9 : vector<16x256xf32>
    %cst_8 = arith.constant 1.000000e+02 : f32
    %11 = vector.broadcast %cst_8 : f32 to vector<16x256xf32>
    %12 = arith.mulf %11, %10 : vector<16x256xf32>
    %cst_9 = arith.constant 2.000000e+01 : f32
    %13 = vector.broadcast %cst_9 : f32 to vector<16x256xf32>
    %14 = arith.minimumf %12, %13 : vector<16x256xf32>
    %cst_10 = arith.constant 2.000000e+01 : f32
    %15 = vector.broadcast %cst_10 : f32 to vector<16x256xf32>
    %16 = arith.cmpf ogt, %12, %15 : vector<16x256xf32>
    %17 = math.exp %14 : vector<16x256xf32>
    %18 = math.log1p %17 : vector<16x256xf32>
    %cst_11 = arith.constant 1.000000e+02 : f32
    %19 = vector.broadcast %cst_11 : f32 to vector<16x256xf32>
    %20 = arith.divf %18, %19 : vector<16x256xf32>
    %21 = arith.select %16, %10, %20 : vector<16x256xi1>, vector<16x256xf32>
    %22 = arith.truncf %21 : vector<16x256xf32> to vector<16x256xbf16>
    %c0_12 = arith.constant 0 : index
    %c0_13 = arith.constant 0 : index
    %23 = vector.load %arg5[%c0_12, %c0_13] : memref<256x256xbf16, #tpu.memory_space<vmem>>, vector<256x256xbf16>
    %cst_14 = arith.constant dense<0.000000e+00> : vector<16x256xf32>
    %24 = tpu.matmul %22, %23, %cst_14 {dimension_numbers = #tpu.dot_dimension_numbers<[1], [0], [0], [1], [0, 0, 1, 1], [], []>} : vector<16x256xbf16>, vector<256x256xbf16>, vector<16x256xf32> -> vector<16x256xf32>
    %c0_15 = arith.constant 0 : index
    %c0_16 = arith.constant 0 : index
    %25 = vector.load %arg6[%c0_15, %c0_16] : memref<1x256xf32, #tpu.memory_space<vmem>>, vector<1x256xf32>
    %26 = vector.broadcast %25 : vector<1x256xf32> to vector<16x256xf32>
    %27 = arith.addf %24, %26 : vector<16x256xf32>
    %cst_17 = arith.constant 1.000000e+02 : f32
    %28 = vector.broadcast %cst_17 : f32 to vector<16x256xf32>
    %29 = arith.mulf %28, %27 : vector<16x256xf32>
    %cst_18 = arith.constant 2.000000e+01 : f32
    %30 = vector.broadcast %cst_18 : f32 to vector<16x256xf32>
    %31 = arith.minimumf %29, %30 : vector<16x256xf32>
    %cst_19 = arith.constant 2.000000e+01 : f32
    %32 = vector.broadcast %cst_19 : f32 to vector<16x256xf32>
    %33 = arith.cmpf ogt, %29, %32 : vector<16x256xf32>
    %34 = math.exp %31 : vector<16x256xf32>
    %35 = math.log1p %34 : vector<16x256xf32>
    %cst_20 = arith.constant 1.000000e+02 : f32
    %36 = vector.broadcast %cst_20 : f32 to vector<16x256xf32>
    %37 = arith.divf %35, %36 : vector<16x256xf32>
    %38 = arith.select %33, %27, %37 : vector<16x256xi1>, vector<16x256xf32>
    %39 = arith.truncf %38 : vector<16x256xf32> to vector<16x256xbf16>
    %c0_21 = arith.constant 0 : index
    %c0_22 = arith.constant 0 : index
    %40 = vector.load %arg7[%c0_21, %c0_22] : memref<256x256xbf16, #tpu.memory_space<vmem>>, vector<256x256xbf16>
    %cst_23 = arith.constant dense<0.000000e+00> : vector<16x256xf32>
    %41 = tpu.matmul %39, %40, %cst_23 {dimension_numbers = #tpu.dot_dimension_numbers<[1], [0], [0], [1], [0, 0, 1, 1], [], []>} : vector<16x256xbf16>, vector<256x256xbf16>, vector<16x256xf32> -> vector<16x256xf32>
    %c0_24 = arith.constant 0 : index
    %c0_25 = arith.constant 0 : index
    %42 = vector.load %arg8[%c0_24, %c0_25] : memref<1x256xf32, #tpu.memory_space<vmem>>, vector<1x256xf32>
    %43 = vector.broadcast %42 : vector<1x256xf32> to vector<16x256xf32>
    %44 = arith.addf %41, %43 : vector<16x256xf32>
    %cst_26 = arith.constant 1.000000e+02 : f32
    %45 = vector.broadcast %cst_26 : f32 to vector<16x256xf32>
    %46 = arith.mulf %45, %44 : vector<16x256xf32>
    %cst_27 = arith.constant 2.000000e+01 : f32
    %47 = vector.broadcast %cst_27 : f32 to vector<16x256xf32>
    %48 = arith.minimumf %46, %47 : vector<16x256xf32>
    %cst_28 = arith.constant 2.000000e+01 : f32
    %49 = vector.broadcast %cst_28 : f32 to vector<16x256xf32>
    %50 = arith.cmpf ogt, %46, %49 : vector<16x256xf32>
    %51 = math.exp %48 : vector<16x256xf32>
    %52 = math.log1p %51 : vector<16x256xf32>
    %cst_29 = arith.constant 1.000000e+02 : f32
    %53 = vector.broadcast %cst_29 : f32 to vector<16x256xf32>
    %54 = arith.divf %52, %53 : vector<16x256xf32>
    %55 = arith.select %50, %44, %54 : vector<16x256xi1>, vector<16x256xf32>
    %56 = arith.truncf %55 : vector<16x256xf32> to vector<16x256xbf16>
    %c0_30 = arith.constant 0 : index
    %c0_31 = arith.constant 0 : index
    %57 = vector.load %arg9[%c0_30, %c0_31] : memref<256x256xbf16, #tpu.memory_space<vmem>>, vector<256x256xbf16>
    %cst_32 = arith.constant dense<0.000000e+00> : vector<16x256xf32>
    %58 = tpu.matmul %56, %57, %cst_32 {dimension_numbers = #tpu.dot_dimension_numbers<[1], [0], [0], [1], [0, 0, 1, 1], [], []>} : vector<16x256xbf16>, vector<256x256xbf16>, vector<16x256xf32> -> vector<16x256xf32>
    %c0_33 = arith.constant 0 : index
    %c0_34 = arith.constant 0 : index
    %59 = vector.load %arg10[%c0_33, %c0_34] : memref<1x256xf32, #tpu.memory_space<vmem>>, vector<1x256xf32>
    %60 = vector.broadcast %59 : vector<1x256xf32> to vector<16x256xf32>
    %61 = arith.addf %58, %60 : vector<16x256xf32>
    %cst_35 = arith.constant 1.000000e+02 : f32
    %62 = vector.broadcast %cst_35 : f32 to vector<16x256xf32>
    %63 = arith.mulf %62, %61 : vector<16x256xf32>
    %cst_36 = arith.constant 2.000000e+01 : f32
    %64 = vector.broadcast %cst_36 : f32 to vector<16x256xf32>
    %65 = arith.minimumf %63, %64 : vector<16x256xf32>
    %cst_37 = arith.constant 2.000000e+01 : f32
    %66 = vector.broadcast %cst_37 : f32 to vector<16x256xf32>
    %67 = arith.cmpf ogt, %63, %66 : vector<16x256xf32>
    %68 = math.exp %65 : vector<16x256xf32>
    %69 = math.log1p %68 : vector<16x256xf32>
    %cst_38 = arith.constant 1.000000e+02 : f32
    %70 = vector.broadcast %cst_38 : f32 to vector<16x256xf32>
    %71 = arith.divf %69, %70 : vector<16x256xf32>
    %72 = arith.select %67, %61, %71 : vector<16x256xi1>, vector<16x256xf32>
    %c0_39 = arith.constant 0 : index
    %c0_40 = arith.constant 0 : index
    %73 = vector.load %arg11[%c0_39, %c0_40] : memref<1x256xf32, #tpu.memory_space<vmem>>, vector<1x256xf32>
    %74 = vector.broadcast %73 : vector<1x256xf32> to vector<16x256xf32>
    %75 = arith.mulf %72, %74 : vector<16x256xf32>
    %cst_41 = arith.constant dense<0.000000e+00> : vector<16xf32>
    %76 = vector.multi_reduction <add>, %75, %cst_41 [1] : vector<16x256xf32> to vector<16xf32>
    %77 = vector.shape_cast %76 : vector<16xf32> to vector<16x1xf32>
    %c0_42 = arith.constant 0 : index
    %c0_43 = arith.constant 0 : index
    %78 = vector.load %arg12[%c0_42, %c0_43] : memref<1x1xf32, #tpu.memory_space<vmem>>, vector<1x1xf32>
    %79 = vector.broadcast %78 : vector<1x1xf32> to vector<16x1xf32>
    %80 = arith.addf %77, %79 : vector<16x1xf32>
    %c0_44 = arith.constant 0 : index
    %c0_45 = arith.constant 0 : index
    %81 = vector.load %arg13[%c0_44, %c0_45] : memref<16x1xf32, #tpu.memory_space<vmem>>, vector<16x1xf32>
    tpu.vector_store %arg13[%c0_44, %c0_45], %80 {strides = array<i32>} : memref<16x1xf32, #tpu.memory_space<vmem>>, vector<16x1xf32>,
    return
  }
  func.func @transform_0(%arg0: i32) -> (i32, i32) {
    %c0_i32 = arith.constant 0 : i32
    %c0_i32_0 = arith.constant 0 : i32
    return %arg0, %c0_i32 : i32, i32
  }
  func.func @transform_1(%arg0: i32) -> (i32, i32) {
    %c0_i32 = arith.constant 0 : i32
    %c0_i32_0 = arith.constant 0 : i32
    %c0_i32_1 = arith.constant 0 : i32
    return %c0_i32, %c0_i32_0 : i32, i32
  }
  func.func @transform_2(%arg0: i32) -> (i32, i32) {
    %c0_i32 = arith.constant 0 : i32
    %c0_i32_0 = arith.constant 0 : i32
    %c0_i32_1 = arith.constant 0 : i32
    return %c0_i32, %c0_i32_0 : i32, i32
  }
  func.func @transform_3(%arg0: i32) -> (i32, i32) {
    %c0_i32 = arith.constant 0 : i32
    %c0_i32_0 = arith.constant 0 : i32
    %c0_i32_1 = arith.constant 0 : i32
    return %c0_i32, %c0_i32_0 : i32, i32
  }
  func.func @transform_4(%arg0: i32) -> (i32, i32) {
    %c0_i32 = arith.constant 0 : i32
    %c0_i32_0 = arith.constant 0 : i32
    %c0_i32_1 = arith.constant 0 : i32
    return %c0_i32, %c0_i32_0 : i32, i32
  }
  func.func @transform_5(%arg0: i32) -> (i32, i32) {
    %c0_i32 = arith.constant 0 : i32
    %c0_i32_0 = arith.constant 0 : i32
    %c0_i32_1 = arith.constant 0 : i32
    return %c0_i32, %c0_i32_0 : i32, i32
  }
  func.func @transform_6(%arg0: i32) -> (i32, i32) {
    %c0_i32 = arith.constant 0 : i32
    %c0_i32_0 = arith.constant 0 : i32
    %c0_i32_1 = arith.constant 0 : i32
    return %c0_i32, %c0_i32_0 : i32, i32
  }
  func.func @transform_7(%arg0: i32) -> (i32, i32) {
    %c0_i32 = arith.constant 0 : i32
    %c0_i32_0 = arith.constant 0 : i32
    %c0_i32_1 = arith.constant 0 : i32
    return %c0_i32, %c0_i32_0 : i32, i32
  }
  func.func @transform_8(%arg0: i32) -> (i32, i32) {
    %c0_i32 = arith.constant 0 : i32
    %c0_i32_0 = arith.constant 0 : i32
    %c0_i32_1 = arith.constant 0 : i32
    return %c0_i32, %c0_i32_0 : i32, i32
  }
  func.func @transform_9(%arg0: i32) -> (i32, i32) {
    %c0_i32 = arith.constant 0 : i32
    %c0_i32_0 = arith.constant 0 : i32
    %c0_i32_1 = arith.constant 0 : i32
    return %c0_i32, %c0_i32_0 : i32, i32
  }
  func.func @transform_10(%arg0: i32) -> (i32, i32) {
    %c0_i32 = arith.constant 0 : i32
    %c0_i32_0 = arith.constant 0 : i32
    %c0_i32_1 = arith.constant 0 : i32
    return %c0_i32, %c0_i32_0 : i32, i32
  }
  func.func @transform_11(%arg0: i32) -> (i32, i32) {
    %c0_i32 = arith.constant 0 : i32
    %c0_i32_0 = arith.constant 0 : i32
    %c0_i32_1 = arith.constant 0 : i32
    return %c0_i32, %c0_i32_0 : i32, i32
  }
  func.func @transform_12(%arg0: i32) -> (i32, i32) {
    %c0_i32 = arith.constant 0 : i32
    %c0_i32_0 = arith.constant 0 : i32
    return %arg0, %c0_i32 : i32, i32
  }
}

</mosaic_0001>

<bundles_post_ra>
// kernel: tpu_custom_call.1
= control target key start
LH: loop header
LB: loop body
LE: loop exit
PB: predicated region body
PF: predicated region fallthrough
CT: control target
= control target key end

     0   :  { %s2862_s0 = inlined_call_operand.vmem [shape: f32[16,8], index: 0, kind: input, shape index: {}]   ;;  %s2863_s1 = inlined_call_operand.vmem [shape: bf16[8,128], index: 1, kind: input, shape index: {}]   ;;  %s2864_s2 = inlined_call_operand.hbm [shape: bf16[128,256], index: 2, kind: input, shape index: {}]   ;;  %s2865_s3 = inlined_call_operand.vmem [shape: f32[1,256], index: 3, kind: input, shape index: {}]   ;;  %s2866_s4 = inlined_call_operand.hbm [shape: bf16[256,256], index: 4, kind: input, shape index: {}]   ;;  %s2867_s5 = inlined_call_operand.vmem [shape: f32[1,256], index: 5, kind: input, shape index: {}]   ;;  %s2868_s6 = inlined_call_operand.hbm [shape: bf16[256,256], index: 6, kind: input, shape index: {}]   ;;  %s2869_s7 = inlined_call_operand.vmem [shape: f32[1,256], index: 7, kind: input, shape index: {}]   ;;  %s2870_s8 = inlined_call_operand.hbm [shape: bf16[256,256], index: 8, kind: input, shape index: {}]   ;;  %s2871_s9 = inlined_call_operand.vmem [shape: f32[1,256], index: 9, kind: input, shape index: {}]   ;;  %s2872_s10 = inlined_call_operand.vmem [shape: f32[1,256], index: 10, kind: input, shape index: {}]   ;;  %s2873_s11 = inlined_call_operand.<no memory space> [shape: f32[1,1], index: 11, kind: input, shape index: {}]   ;;  %s2874_s12 = inlined_call_operand.vmem [shape: f32[16,1], index: 12, kind: output, shape index: {}]  }
   0x1   :  { %v17_v0 = vstv %s2873_s11 }
   0x2   :  { %18 = vst [vmem:[#allocation2] sm:$0x1] %v17_v0 }
   0x3   :  { %19 = vsyncpa [#allocation4], 0 }
   0x4   :  { %20 = vsyncpa [#allocation6], 0 }
   0x5   :  { %21 = vsyncpa [#allocation9], 0  ;;  %s45_s25 = sshll.u32 %s2866_s4, 4  ;;  %s2387_s26 = smov [#allocation5]   ;;  %s46_s25 = int_to_ptr.hbm [resolvable:$true] %s45_s25 }
   0x6   :  { %s47_s27 = sshll.u32 %s2387_s26, 4  ;;  %s30_s30 = sshll.u32 %s2864_s2, 4  ;;  %s48_s27 = int_to_ptr.vmem [resolvable:$true] %s47_s27  ;;  %s31_s30 = int_to_ptr.hbm [resolvable:$true] %s30_s30 }
   0x7   :  { %s2388_s13 = smov 128   ;;  %s2389_s14 = smov 8  }
   0x8   :  { %53 = dma.hbm_to_vmem [thread:$0]  %s46_s25, 4096, %s48_s27, [#allocation6], %s2388_s13, %s2388_s13, %s2389_s14  }
   0x9   :  { %s2390_s11 = smov [#allocation3]   ;;  %s60_s18 = sshll.u32 %s2868_s6, 4  ;;  %s61_s18 = int_to_ptr.hbm [resolvable:$true] %s60_s18 }
   0xa   :  { %s32_s15 = sshll.u32 %s2390_s11, 4  ;;  %s75_s20 = sshll.u32 %s2870_s8, 4  ;;  %s33_s15 = int_to_ptr.vmem [resolvable:$true] %s32_s15  ;;  %s76_s20 = int_to_ptr.hbm [resolvable:$true] %s75_s20 }
   0xb   :  { %38 = dma.hbm_to_vmem [thread:$0]  %s31_s30, 2048, %s33_s15, [#allocation4], %s2388_s13, %s2388_s13, %s2389_s14  }
   0xc   :  { %s2391_s21 = smov [#allocation7]   ;;  %s2392_s2 = smov [#allocation8]  }
   0xd   :  { %s62_s22 = sshll.u32 %s2391_s21, 4  ;;  %s77_s23 = sshll.u32 %s2392_s2, 4  ;;  %s63_s22 = int_to_ptr.vmem [resolvable:$true] %s62_s22  ;;  %s78_s23 = int_to_ptr.vmem [resolvable:$true] %s77_s23 }
   0xe   :  { %68 = dma.hbm_to_vmem [thread:$0]  %s61_s18, 4096, %s63_s22, [#allocation6], %s2388_s13, %s2388_s13, %s2389_s14  }
   0xf   :  { %83 = dma.hbm_to_vmem [thread:$0]  %s76_s20, 4096, %s78_s23, [#allocation9], %s2388_s13, %s2388_s13, %s2389_s14  }
  0x10   :  { %2381 = dma.done.wait [#allocation4], 2048  }
  0x11   :  { %2382 = vsyncadd [#allocation4], 4294965248 }
  0x12   :  { %2383 = dma.done.wait [#allocation6], 8192  }
  0x13   :  { %2384 = vsyncadd [#allocation6], 4294959104 }
  0x14   :  { %2385 = dma.done.wait [#allocation9], 4096  }
  0x15   :  { %2386 = vsyncadd [#allocation9], 4294963200  ;;  %vm115_vm0 = vcmask 1043456   ;;  %v110_v1 = vld [vmem:[%s2863_s1] sm:$0xf]  ;;  %v108_v3 = vld [vmem:[%s2862_s0 + $0x8] sm:$0xff] }
  0x16   :  { %v107_v2 = vld [vmem:[%s2862_s0] sm:$0xff]  ;;  %v117_v4 = vsel %vm115_vm0, %v110_v1, 0  ;;  %vm111_vm1 = vcmask 64512   ;;  %v2393_v25 = vmov 683565275  }
  0x17   :  { %v109_v5 = vpack.c.bf16 %v108_v3, %v107_v2  ;;  %126 = vmatpush.bf16.msra.mxu0 %v117_v4  ;;  %v2394_v27 = vmov 2475754826   ;;  %v2395_v29 = vmov 2131351028   ;;  %v2396_v31 = vmov 2102212464  }
  0x18   :  { %v2397_v36 = vmov 920167782   ;;  %v2398_v39 = vmov 1326507024  }
  0x1a   :  { %1637 = vmatmul.msk.bf16.vlgmr.msra.gmra.mxu0 %vm111_vm1, %v109_v5 }
  0x97   :  { %v2490_v6 = vpop.f32.mrf.mxu0 }
  0x98   :  { %v133_v7 = vand.u32 2147483647, %v2490_v6  ;;  %v136_v8 = vand.u32 2139095040, %v2490_v6 }
  0x9a   :  { %v137_v9 = vshrl.u32 %v136_v8, 23  ;;  %v140_v10 = vand.u32 8388607, %v133_v7 }
  0x9c   :  { %v1638_v11 = vadd.s32 4294967169, %v137_v9  ;;  %v141_v12 = vor.u32 8388608, %v140_v10 }
  0x9e   :  { %v143_v13 = vadd.s32 1, %v1638_v11  ;;  %v2498_v15 = vshll.u32 %v141_v12, 8 }
  0x9f   :  { %v2496_v14 = vpop.f32.mrf.mxu0 }
  0xa0   :  { %vm144_vm2 = vcmp.gt.s32.totalorder %v143_v13, 0  ;;  %v288_v16 = vand.u32 2147483647, %v2496_v14  ;;  %v291_v18 = vand.u32 2139095040, %v2496_v14  ;;  %v182_v22 = vand.u32 65535, %v2498_v15 }
  0xa1   :  { %v145_v17 = vsel %vm144_vm2, %v143_v13, 0  ;;  %v183_v61 = vshrl.u32 %v2498_v15, 16 }
  0xa2   :  { %v147_v19 = vand.u32 31, %v145_v17  ;;  %v146_v20 = vshrl.u32 %v145_v17, 5  ;;  %v292_v23 = vshrl.u32 %v291_v18, 23  ;;  %v295_v24 = vand.u32 8388607, %v288_v16 }
  0xa4   :  { %v148_v21 = vsub.s32 32, %v147_v19  ;;  %v150_v26 = vshll.u32 %v2393_v25, %v147_v19  ;;  %v153_v28 = vshll.u32 %v2394_v27, %v147_v19  ;;  %v156_v30 = vshll.u32 %v2395_v29, %v147_v19 }
  0xa5   :  { %v159_v32 = vshll.u32 %v2396_v31, %v147_v19  ;;  %v162_v37 = vshll.u32 %v2397_v36, %v147_v19  ;;  %vm165_vm3 = vcmp.lt.s32.totalorder %v146_v20, 1  ;;  %vm166_vm4 = vcmp.lt.s32.totalorder %v146_v20, 2 }
  0xa6   :  { %v151_v33 = vshrl.u32 %v2394_v27, %v148_v21  ;;  %v154_v34 = vshrl.u32 %v2395_v29, %v148_v21  ;;  %v157_v35 = vshrl.u32 %v2396_v31, %v148_v21  ;;  %v160_v38 = vshrl.u32 %v2397_v36, %v148_v21 }
  0xa7   :  { %v163_v40 = vshrl.u32 %v2398_v39, %v148_v21  ;;  %v1641_v44 = vadd.s32 4294967169, %v292_v23  ;;  %v149_v45 = vshrl.u32 %v2393_v25, %v148_v21  ;;  %vm168_vm5 = vcmp.lt.s32.totalorder %v146_v20, 4 }
  0xa8   :  { %v152_v41 = vor.u32 %v151_v33, %v150_v26  ;;  %v155_v42 = vor.u32 %v154_v34, %v153_v28  ;;  %v158_v43 = vor.u32 %v157_v35, %v156_v30  ;;  %v161_v46 = vor.u32 %v160_v38, %v159_v32 }
  0xa9   :  { %v164_v47 = vor.u32 %v163_v40, %v162_v37  ;;  %vm167_vm6 = vcmp.lt.s32.totalorder %v146_v20, 3  ;;  %v296_v53 = vor.u32 8388608, %v295_v24  ;;  %v298_v54 = vadd.s32 1, %v1641_v44 }
  0xaa   :  { %v170_v48 = vsel %vm168_vm5, %v158_v43, 2102212464  ;;  %v173_v49 = vsel %vm165_vm3, %v152_v41, %v155_v42  ;;  %v177_v50 = vsel %vm165_vm3, %v155_v42, %v158_v43  ;;  %v174_v51 = vsel %vm168_vm5, %v161_v46, 920167782 }
  0xab   :  { %v178_v52 = vsel %vm168_vm5, %v164_v47, 1326507024  ;;  %v169_v55 = vsel %vm165_vm3, %v149_v45, %v152_v41  ;;  %v171_v56 = vsel %vm167_vm6, %v155_v42, %v170_v48  ;;  %v175_v57 = vsel %vm167_vm6, %v158_v43, %v174_v51 }
  0xac   :  { %v179_v58 = vsel %vm167_vm6, %v161_v46, %v178_v52  ;;  %v176_v59 = vsel %vm166_vm4, %v173_v49, %v175_v57  ;;  %vm299_vm7 = vcmp.gt.s32.totalorder %v298_v54, 0  ;;  %v2523_v2 = vsel %vm166_vm4, %v169_v55, %v171_v56 }
  0xad   :  { %v180_v60 = vsel %vm166_vm4, %v177_v50, %v179_v58  ;;  %v206_v0 = vand.u32 65535, %v176_v59  ;;  %v207_v1 = vshrl.u32 %v176_v59, 16  ;;  %v300_v5 = vsel %vm299_vm7, %v298_v54, 0 }
  0xae   :  { %v184_v62 = vand.u32 65535, %v180_v60  ;;  %v185_v63 = vshrl.u32 %v180_v60, 16  ;;  %v2525_v8 = vshll.u32 %v296_v53, 8  ;;  %v302_v30 = vand.u32 31, %v300_v5 }
  0xaf   :  { %v209_v11 = vmul.u32 %v207_v1, %v182_v22  ;;  %v210_v12 = vmul.u32 %v206_v0, %v183_v61  ;;  %v208_v18 = vmul.u32 %v206_v0, %v182_v22  ;;  %v211_v19 = vmul.u32 %v207_v1, %v183_v61 }
  0xb0   :  { %v187_v3 = vmul.u32 %v185_v63, %v182_v22  ;;  %v188_v4 = vmul.u32 %v184_v62, %v183_v61  ;;  %v186_v9 = vmul.u32 %v184_v62, %v182_v22  ;;  %v189_v10 = vmul.u32 %v185_v63, %v183_v61 }
  0xb1   :  { %v212_v24 = vshll.u32 %v209_v11, 16  ;;  %v213_v26 = vshrl.u32 %v209_v11, 16  ;;  %v214_v28 = vshll.u32 %v210_v12, 16  ;;  %v2399_v32 = vmov 0  }
  0xb2   :  { %v190_v13 = vshll.u32 %v187_v3, 16  ;;  %v191_v17 = vshrl.u32 %v187_v3, 16  ;;  %v192_v21 = vshll.u32 %v188_v4, 16  ;;  %v193_v23 = vshrl.u32 %v188_v4, 16 }
  0xb3   :  { %v215_v34 = vshrl.u32 %v210_v12, 16  ;;  %vm216_vm9 = vc.u32 %v208_v18, %v212_v24  ;;  %v218_v35 = vadd.s32 %v212_v24, %v208_v18  ;;  %v2529_v22 = vsub.s32 32, %v302_v30 }
  0xb4   :  { %vm194_vm8 = vc.u32 %v186_v9, %v190_v13  ;;  %v196_v20 = vadd.s32 %v190_v13, %v186_v9  ;;  %v217_v38 = vsel %vm216_vm9, 1, %v2399_v32  ;;  %v2532_v42 = vshrl.u32 %v300_v5, 5 }
  0xb5   :  { %v195_v33 = vsel %vm194_vm8, 1, %v2399_v32  ;;  %v219_v41 = vadd.s32 %v217_v38, %v211_v19  ;;  %vm220_vm11 = vc.u32 %v218_v35, %v214_v28  ;;  %v2535_v45 = vadd.s32 %v218_v35, %v214_v28 }
  0xb6   :  { %v197_v37 = vadd.s32 %v195_v33, %v189_v10  ;;  %vm198_vm10 = vc.u32 %v196_v20, %v192_v21  ;;  %v221_v44 = vsel %vm220_vm11, 1, %v2399_v32  ;;  %v305_v46 = vshll.u32 %v2393_v25, %v302_v30 }
  0xb7   :  { %v199_v40 = vsel %vm198_vm10, 1, %v2399_v32  ;;  %v223_v47 = vadd.s32 %v221_v44, %v219_v41  ;;  %v306_v48 = vshrl.u32 %v2394_v27, %v2529_v22  ;;  %v308_v49 = vshll.u32 %v2394_v27, %v302_v30 }
  0xb8   :  { %v201_v43 = vadd.s32 %v199_v40, %v197_v37  ;;  %v309_v50 = vshrl.u32 %v2395_v29, %v2529_v22  ;;  %v311_v52 = vshll.u32 %v2395_v29, %v302_v30  ;;  %v312_v53 = vshrl.u32 %v2396_v31, %v2529_v22 }
  0xb9   :  { %v314_v54 = vshll.u32 %v2396_v31, %v302_v30  ;;  %v224_v55 = vadd.s32 %v223_v47, %v213_v26  ;;  %v2547_v56 = vor.u32 %v306_v48, %v305_v46  ;;  %v315_v58 = vshrl.u32 %v2397_v36, %v2529_v22 }
  0xba   :  { %v202_v51 = vadd.s32 %v201_v43, %v191_v17  ;;  %v2549_v57 = vor.u32 %v309_v50, %v308_v49  ;;  %v313_v59 = vor.u32 %v312_v53, %v311_v52  ;;  %v317_v60 = vshll.u32 %v2397_v36, %v302_v30 }
  0xbb   :  { %v318_v29 = vshrl.u32 %v2398_v39, %v2529_v22  ;;  %v225_v61 = vadd.s32 %v224_v55, %v215_v34  ;;  %v316_v62 = vor.u32 %v315_v58, %v314_v54  ;;  %v226_v31 = vmul.u32 %v2498_v15, %v2523_v2 }
  0xbc   :  { %v2553_v27 = vadd.s32 %v202_v51, %v193_v23  ;;  %vm320_vm13 = vcmp.lt.s32.totalorder %v2532_v42, 1  ;;  %vm323_vm14 = vcmp.lt.s32.totalorder %v2532_v42, 4  ;;  %v337_v39 = vand.u32 65535, %v2525_v8 }
  0xbd   :  { %v319_v63 = vor.u32 %v318_v29, %v317_v60  ;;  %v229_v0 = vadd.s32 1, %v225_v61  ;;  %v328_v36 = vsel %vm320_vm13, %v2547_v56, %v2549_v57  ;;  %vm322_vm15 = vcmp.lt.s32.totalorder %v2532_v42, 3 }
  0xbe   :  { %vm228_vm12 = vc.u32 %v2553_v27, %v2535_v45  ;;  %v329_v15 = vsel %vm323_vm14, %v316_v62, 920167782  ;;  %v332_v1 = vsel %vm320_vm13, %v2549_v57, %v313_v59  ;;  %vm321_vm0 = vcmp.lt.s32.totalorder %v2532_v42, 2 }
  0xbf   :  { %v333_v2 = vsel %vm323_vm14, %v319_v63, 1326507024  ;;  %v230_v3 = vsel %vm228_vm12, %v229_v0, %v225_v61  ;;  %v330_v4 = vsel %vm322_vm15, %v313_v59, %v329_v15  ;;  %v338_v12 = vshrl.u32 %v2525_v8, 16 }
  0xc0   :  { %v334_v5 = vsel %vm322_vm15, %v316_v62, %v333_v2  ;;  %v231_v9 = vadd.s32 %v230_v3, %v226_v31  ;;  %v331_v10 = vsel %vm321_vm0, %v328_v36, %v330_v4  ;;  %v325_v35 = vsel %vm323_vm14, %v313_v59, 2102212464  ;;  %v1702_v4 = vld [vmem:[#allocation3 + $0x70] sm:$0xf] }
  0xc1   :  { %v335_v11 = vsel %vm321_vm0, %v332_v1, %v334_v5  ;;  %v361_v18 = vand.u32 65535, %v331_v10  ;;  %v362_v19 = vshrl.u32 %v331_v10, 16  ;;  %v304_v60 = vshrl.u32 %v2393_v25, %v2529_v22  ;;  %v2107_v5 = vld [vmem:[#allocation3 + $0x74] sm:$0xf0]  ;;  %v1704_v10 = vld [vmem:[#allocation3 + $0x78] sm:$0xf0] }
  0xc2   :  { %v339_v13 = vand.u32 65535, %v335_v11  ;;  %v340_v17 = vshrl.u32 %v335_v11, 16  ;;  %v232_v21 = vadd.s32 536870912, %v231_v9  ;;  %v227_v11 = vadd.s32 %v2535_v45, %v2553_v27 }
  0xc3   :  { %v364_v20 = vmul.u32 %v362_v19, %v337_v39  ;;  %v365_v28 = vmul.u32 %v361_v18, %v338_v12  ;;  %v363_v43 = vmul.u32 %v361_v18, %v337_v39  ;;  %v366_v47 = vmul.u32 %v362_v19, %v338_v12 }
  0xc4   :  { %v342_v23 = vmul.u32 %v340_v17, %v337_v39  ;;  %v343_v24 = vmul.u32 %v339_v13, %v338_v12  ;;  %v2587_v26 = vshrl.u32 %v232_v21, 30  ;;  %v341_v30 = vmul.u32 %v339_v13, %v337_v39 }
  0xc5   :  { %v344_v37 = vmul.u32 %v340_v17, %v338_v12  ;;  %v367_v38 = vshll.u32 %v364_v20, 16  ;;  %v369_v48 = vshll.u32 %v365_v28, 16  ;;  %v368_v63 = vshrl.u32 %v364_v20, 16  ;;  %v1694_v20 = vld [vmem:[#allocation3 + $0x60] sm:$0xf] }
  0xc6   :  { %v345_v33 = vshll.u32 %v342_v23, 16  ;;  %v234_v34 = vshll.u32 %v2587_v26, 30  ;;  %v347_v40 = vshll.u32 %v343_v24, 16  ;;  %v346_v54 = vshrl.u32 %v342_v23, 16 }
  0xc7   :  { %vm371_vm3 = vc.u32 %v363_v43, %v367_v38  ;;  %v373_v50 = vadd.s32 %v367_v38, %v363_v43  ;;  %v348_v29 = vshrl.u32 %v343_v24, 16  ;;  %v324_v36 = vsel %vm320_vm13, %v304_v60, %v2547_v56  ;;  %v1680_v60 = vld [vmem:[#allocation3 + $0x48] sm:$0xf0] }
  0xc8   :  { %vm349_vm1 = vc.u32 %v341_v30, %v345_v33  ;;  %v351_v41 = vadd.s32 %v345_v33, %v341_v30  ;;  %v235_v44 = vsub.s32 %v231_v9, %v234_v34  ;;  %v372_v53 = vsel %vm371_vm3, 1, %v2399_v32  ;;  %v2104_v34 = vld [vmem:[#allocation3 + $0x64] sm:$0xf] }
  0xc9   :  { %v350_v46 = vsel %vm349_vm1, 1, %v2399_v32  ;;  %v374_v58 = vadd.s32 %v372_v53, %v366_v47  ;;  %vm375_vm5 = vc.u32 %v373_v50, %v369_v48  ;;  %v326_v39 = vsel %vm322_vm15, %v2549_v57, %v325_v35  ;;  %v2106_v57 = vld [vmem:[#allocation3 + $0x74] sm:$0xf]  ;;  %v1696_v35 = vld [vmem:[#allocation3 + $0x68] sm:$0xf0] }
  0xca   :  { %v352_v49 = vadd.s32 %v350_v46, %v344_v37  ;;  %vm353_vm2 = vc.u32 %v351_v41, %v347_v40  ;;  %vm236_vm4 = vcmp.lt.s32.totalorder %v235_v44, 0  ;;  %v237_v51 = vsub.s32 0, %v235_v44  ;;  %v2103_v41 = vld [vmem:[#allocation3 + $0x54] sm:$0xf0]  ;;  %v2102_v46 = vld [vmem:[#allocation3 + $0x54] sm:$0xf] }
  0xcb   :  { %v354_v52 = vsel %vm353_vm2, 1, %v2399_v32  ;;  %v376_v61 = vsel %vm375_vm5, 1, %v2399_v32  ;;  %v370_v2 = vshrl.u32 %v365_v28, 16  ;;  %v2606_v22 = vadd.s32 %v373_v50, %v369_v48  ;;  %v2105_v28 = vld [vmem:[#allocation3 + $0x64] sm:$0xf0] }
  0xcc   :  { %v356_v55 = vadd.s32 %v354_v52, %v352_v49  ;;  %v238_v59 = vsel %vm236_vm4, %v237_v51, %v235_v44  ;;  %v378_v0 = vadd.s32 %v376_v61, %v374_v58  ;;  %v327_v32 = vsel %vm321_vm0, %v324_v36, %v326_v39  ;;  %v1688_v47 = vld [vmem:[#allocation3 + $0x58] sm:$0xf0]  ;;  %v1678_v53 = vld [vmem:[#allocation3 + $0x40] sm:$0xf]  ;;  %v2099_v36 = vld [vmem:[#allocation3 + $0x34] sm:$0xf0] }
  0xcd   :  { %v239_v62 = vclz %v238_v59  ;;  %v1703_v56 = vor.u32 %v2107_v5, %v1702_v4  ;;  %v381_v18 = vmul.u32 %v2525_v8, %v327_v32  ;;  %v1707_v42 = vor.u32 %v2106_v57, %v1704_v10  ;;  %v1686_v8 = vld [vmem:[#allocation3 + $0x50] sm:$0xf]  ;;  %v2098_v39 = vld [vmem:[#allocation3 + $0x34] sm:$0xf]  ;;  %v2097_v57 = vld [vmem:[#allocation3 + $0x24] sm:$0xf0] }
  0xce   :  { %v357_v31 = vadd.s32 %v356_v55, %v346_v54  ;;  %v379_v25 = vadd.s32 %v378_v0, %v368_v63  ;;  %v1695_v33 = vor.u32 %v2105_v28, %v1694_v20  ;;  %v1699_v27 = vor.u32 %v2104_v34, %v1696_v35  ;;  %v2101_v54 = vld [vmem:[#allocation3 + $0x44] sm:$0xf0]  ;;  %v2100_v55 = vld [vmem:[#allocation3 + $0x44] sm:$0xf]  ;;  %v1670_v0 = vld [vmem:[#allocation3 + $0x30] sm:$0xf] }
  0xcf   :  { %v1639_v15 = vadd.s32 4294967294, %v239_v62  ;;  %546 = vmatpush.bf16.msra.mxu1 %v1703_v56  ;;  %560 = vmatpush.bf16.msra.mxu2 %v1707_v42  ;;  %v1691_v50 = vor.u32 %v2102_v46, %v1688_v47  ;;  %v1679_v59 = vor.u32 %v2101_v54, %v1678_v53  ;;  %v1683_v61 = vor.u32 %v2100_v55, %v1680_v60  ;;  %v1662_v56 = vld [vmem:[#allocation3 + $0x20] sm:$0xf]  ;;  %v2096_v10 = vld [vmem:[#allocation3 + $0x24] sm:$0xf] }
  0xd0   :  { %v2604_v1 = vadd.s32 %v357_v31, %v348_v29  ;;  %v380_v3 = vadd.s32 %v379_v25, %v370_v2  ;;  %vm2620_vm8 = vcmp.le.f32.partialorder %v133_v7, 0.7853982  ;;  %vm135_vm9 = vcmp.lt.s32.totalorder %v2490_v6, 0  ;;  %v1672_v25 = vld [vmem:[#allocation3 + $0x38] sm:$0xf0] }
  0xd1   :  { %vm1640_vm6 = vcmp.lt.s32.totalorder %v1639_v15, 0  ;;  %v1671_v2 = vor.u32 %v2099_v36, %v1670_v0  ;;  %v1675_v4 = vor.u32 %v2098_v39, %v1672_v25  ;;  %v2095_v42 = vld [vmem:[#allocation3 + $0x14] sm:$0xf0]  ;;  %v1656_v20 = vld [vmem:[#allocation3 + $0x18] sm:$0xf0]  ;;  %v257_v53 = vsub.s32 4, %v2587_v26 }
  0xd2   :  { %v242_v9 = vsel %vm1640_vm6, 0, %v1639_v15  ;;  %vm383_vm7 = vc.u32 %v2604_v1, %v2606_v22  ;;  %v384_v17 = vadd.s32 1, %v380_v3  ;;  %v1646_v34 = vld [vmem:[#allocation3] sm:$0xf]  ;;  %v2093_v35 = vld [vmem:[#allocation3 + $0x4] sm:$0xf0]  ;;  %vm276_vm4 = vweird.f32 %v2490_v6 }
  0xd3   :  { %v243_v12 = vsub.s32 32, %v242_v9  ;;  %v247_v13 = vsub.s32 4294967266, %v242_v9  ;;  %v244_v19 = vshll.u32 %v235_v44, %v242_v9  ;;  %547 = vmatpush.bf16.msra.mxu1 %v1695_v33  ;;  %561 = vmatpush.bf16.msra.mxu2 %v1699_v27  ;;  %v1687_v44 = vor.u32 %v2103_v41, %v1686_v8 }
  0xd4   :  { %v385_v24 = vsel %vm383_vm7, %v384_v17, %v380_v3  ;;  %v1654_v17 = vld [vmem:[#allocation3 + $0x10] sm:$0xf]  ;;  %vm290_vm12 = vcmp.lt.s32.totalorder %v2496_v14, 0  ;;  %vm2647_vm13 = vcmp.le.f32.partialorder %v288_v16, 0.7853982  ;;  %vm431_vm5 = vweird.f32 %v2496_v14 }
  0xd5   :  { %v245_v21 = vshrl.u32 %v227_v11, %v243_v12  ;;  %v248_v23 = vadd.s32 127, %v247_v13  ;;  %v386_v30 = vadd.s32 %v385_v24, %v381_v18  ;;  %v1664_v11 = vld [vmem:[#allocation3 + $0x28] sm:$0xf0]  ;;  %v1663_v12 = vor.u32 %v2097_v57, %v1662_v56 }
  0xd6   :  { %v1667_v13 = vor.u32 %v2096_v10, %v1664_v11 }
  0xd7   :  { %v246_v37 = vor.u32 %v245_v21, %v244_v19  ;;  %v249_v45 = vshll.u32 %v248_v23, 23  ;;  %v387_v38 = vadd.s32 536870912, %v386_v30  ;;  %548 = vmatpush.bf16.msra.mxu1 %v1687_v44  ;;  %562 = vmatpush.bf16.msra.mxu2 %v1691_v50  ;;  %v2094_v19 = vld [vmem:[#allocation3 + $0x14] sm:$0xf]  ;;  %v382_v21 = vadd.s32 %v2606_v22, %v2604_v1 }
  0xd8   :  { %v1659_v33 = vor.u32 %v2094_v19, %v1656_v20  ;;  %v1647_v44 = vor.u32 %v2093_v35, %v1646_v34 }
  0xd9   :  { %v250_v40 = vor.u32 4788187, %v249_v45  ;;  %v2615_v43 = vshrl.u32 %v387_v38, 30  ;;  %v253_v49 = vcvt.s32.f32 %v246_v37  ;;  %v2092_v38 = vld [vmem:[#allocation3 + $0x4] sm:$0xf] }
  0xdb   :  { %v251_v48 = vand.u32 2147483647, %v250_v40  ;;  %v389_v51 = vshll.u32 %v2615_v43, 30  ;;  %549 = vmatpush.bf16.msra.mxu1 %v1679_v59  ;;  %563 = vmatpush.bf16.msra.mxu2 %v1683_v61  ;;  %v1648_v40 = vld [vmem:[#allocation3 + $0x8] sm:$0xf0]  ;;  %v412_v61 = vsub.s32 4, %v2615_v43 }
  0xdc   :  { %v1651_v22 = vor.u32 %v2092_v38, %v1648_v40  ;;  %v1766_v38 = vld [vmem:[#allocation5 + $0x70] sm:$0xf]  ;;  %v2123_v40 = vld [vmem:[#allocation5 + $0x74] sm:$0xf0] }
  0xdd   :  { %v254_v52 = vmul.f32 %v253_v49, %v251_v48  ;;  %v390_v58 = vsub.s32 %v386_v30, %v389_v51  ;;  %v1655_v30 = vor.u32 %v2095_v42, %v1654_v17  ;;  %v2119_v59 = vld [vmem:[#allocation5 + $0x54] sm:$0xf0] }
  0xdf   :  { %v255_v29 = vxor.u32 2147483648, %v254_v52  ;;  %vm391_vm10 = vcmp.lt.s32.totalorder %v390_v58, 0  ;;  %v392_v31 = vsub.s32 0, %v390_v58  ;;  %550 = vmatpush.bf16.msra.mxu1 %v1671_v2  ;;  %564 = vmatpush.bf16.msra.mxu2 %v1675_v4  ;;  %v413_v2 = vsel %vm290_vm12, %v412_v61, %v2615_v43  ;;  %v1752_v61 = vld [vmem:[#allocation5 + $0x58] sm:$0xf0] }
  0xe0   :  { %v415_v56 = vsel %vm2647_vm13, 0, %v413_v2 }
  0xe1   :  { %v256_v63 = vsel %vm135_vm9, %v255_v29, %v254_v52  ;;  %v393_v7 = vsel %vm391_vm10, %v392_v31, %v390_v58  ;;  %v258_v29 = vsel %vm135_vm9, %v257_v53, %v2587_v26 }
  0xe2   :  { %v2630_v15 = vsel %vm2620_vm8, %v2490_v6, %v256_v63  ;;  %v394_v3 = vclz %v393_v7  ;;  %v260_v16 = vsel %vm2620_vm8, 0, %v258_v29 }
  0xe3   :  { %v2634_v32 = vmul.f32 %v2630_v15, %v2630_v15  ;;  %551 = vmatpush.bf16.msra.mxu1 %v1663_v12  ;;  %565 = vmatpush.bf16.msra.mxu2 %v1667_v13  ;;  %v277_v4 = vadd.s32 3, %v260_v16  ;;  %v432_v13 = vadd.s32 3, %v415_v56  ;;  %v2135_v56 = vld [vmem:[#allocation5 + $0xd4] sm:$0xf0] }
  0xe4   :  { %v1642_v9 = vadd.s32 4294967294, %v394_v3 }
  0xe5   :  { %v269_v5 = vmul.f32 -0.00019511016, %v2634_v32  ;;  %v262_v1 = vmul.f32 -0.001358992, %v2634_v32  ;;  %v278_v62 = vand.u32 3, %v277_v4 }
  0xe6   :  { %vm1643_vm11 = vcmp.lt.s32.totalorder %v1642_v9, 0 }
  0xe7   :  { %v397_v18 = vsel %vm1643_vm11, 0, %v1642_v9  ;;  %v270_v28 = vadd.f32 0.008332121, %v269_v5  ;;  %552 = vmatpush.bf16.msra.mxu1 %v1655_v30  ;;  %566 = vmatpush.bf16.msra.mxu2 %v1659_v33  ;;  %v263_v50 = vadd.f32 0.041655596, %v262_v1  ;;  %vm280_vm14 = vcmp.eq.s32.totalorder %v278_v62, 0 }
  0xe8   :  { %v398_v23 = vsub.s32 32, %v397_v18  ;;  %v402_v24 = vsub.s32 4294967266, %v397_v18  ;;  %v399_v37 = vshll.u32 %v390_v58, %v397_v18  ;;  %vm283_vm15 = vcmp.eq.s32.totalorder %v278_v62, 2 }
  0xe9   :  { %v271_v46 = vmul.f32 %v270_v28, %v2634_v32  ;;  %v264_v55 = vmul.f32 %v263_v50, %v2634_v32  ;;  %vm279_vm0 = vcmp.lt.s32.totalorder %v278_v62, 2  ;;  %v2139_v50 = vld [vmem:[#allocation5 + $0xf4] sm:$0xf0]  ;;  %v1734_v62 = vld [vmem:[#allocation5 + $0x30] sm:$0xf] }
  0xea   :  { %v400_v45 = vshrl.u32 %v382_v21, %v398_v23  ;;  %v403_v27 = vadd.s32 127, %v402_v24  ;;  %v433_v21 = vand.u32 3, %v432_v13 }
  0xeb   :  { %553 = vmatpush.bf16.msra.mxu1 %v1647_v44  ;;  %567 = vmatpush.bf16.msra.mxu2 %v1651_v22  ;;  %v272_v51 = vadd.f32 -0.16666654, %v271_v46  ;;  %v265_v0 = vadd.f32 -0.4999988, %v264_v55  ;;  %v1768_v44 = vld [vmem:[#allocation5 + $0x78] sm:$0xf0] }
  0xec   :  { %v401_v8 = vor.u32 %v400_v45, %v399_v37  ;;  %v404_v41 = vshll.u32 %v403_v27, 23  ;;  %vm435_vm1 = vcmp.eq.s32.totalorder %v433_v21, 0  ;;  %vm438_vm2 = vcmp.eq.s32.totalorder %v433_v21, 2  ;;  %v1758_v22 = vld [vmem:[#allocation5 + $0x60] sm:$0xf] }
  0xed   :  { %v273_v58 = vmul.f32 %v272_v51, %v2634_v32  ;;  %v266_v3 = vmul.f32 %v265_v0, %v2634_v32  ;;  %vm434_vm3 = vcmp.lt.s32.totalorder %v433_v21, 2  ;;  %v2121_v46 = vld [vmem:[#allocation5 + $0x64] sm:$0xf0]  ;;  %v2138_v51 = vld [vmem:[#allocation5 + $0xf4] sm:$0xf] }
  0xee   :  { %v405_v47 = vor.u32 4788187, %v404_v41  ;;  %v408_v49 = vcvt.s32.f32 %v401_v8  ;;  %v2122_v8 = vld [vmem:[#allocation5 + $0x74] sm:$0xf]  ;;  %v1767_v41 = vor.u32 %v2123_v40, %v1766_v38  ;;  %v1759_v6 = vor.u32 %v2121_v46, %v1758_v22  ;;  %v2137_v0 = vld [vmem:[#allocation5 + $0xe4] sm:$0xf0] }
  0xef   :  { %v274_v36 = vadd.f32 1.0, %v273_v58  ;;  %v267_v11 = vadd.f32 1.0, %v266_v3  ;;  %v1771_v1 = vor.u32 %v2122_v8, %v1768_v44  ;;  %v1750_v58 = vld [vmem:[#allocation5 + $0x50] sm:$0xf]  ;;  %v2117_v3 = vld [vmem:[#allocation5 + $0x44] sm:$0xf0] }
  0xf0   :  { %v406_v48 = vand.u32 2147483647, %v405_v47  ;;  %845 = vmatpush.bf16.msra.mxu3 %v1767_v41  ;;  %v2120_v47 = vld [vmem:[#allocation5 + $0x64] sm:$0xf]  ;;  %v1751_v29 = vor.u32 %v2119_v59, %v1750_v58  ;;  %v2133_v21 = vld [vmem:[#allocation5 + $0xc4] sm:$0xf0] }
  0xf1   :  { %v275_v5 = vmul.f32 %v274_v36, %v2630_v15  ;;  %v284_v19 = vxor.u32 2147483648, %v267_v11  ;;  %873 = vmatpush.bf16.msrb.mxu1 %v1771_v1  ;;  %v2136_v36 = vld [vmem:[#allocation5 + $0xe4] sm:$0xf]  ;;  %v1800_v38 = vld [vmem:[#allocation5 + $0xb8] sm:$0xf0] }
  0xf2   :  { %v409_v52 = vmul.f32 %v408_v49, %v406_v48  ;;  %v1760_v48 = vld [vmem:[#allocation5 + $0x68] sm:$0xf0]  ;;  %v1830_v49 = vld [vmem:[#allocation5 + $0xf0] sm:$0xf]  ;;  %v2111_v41 = vld [vmem:[#allocation5 + $0x14] sm:$0xf0] }
  0xf3   :  { %v281_v18 = vxor.u32 2147483648, %v275_v5  ;;  %v285_v20 = vsel %vm283_vm15, %v284_v19, %v275_v5  ;;  %v1831_v53 = vor.u32 %v2139_v50, %v1830_v49  ;;  %v1744_v5 = vld [vmem:[#allocation5 + $0x48] sm:$0xf0]  ;;  %v1718_v8 = vld [vmem:[#allocation5 + $0x10] sm:$0xf] }
  0xf4   :  { %v410_v54 = vxor.u32 2147483648, %v409_v52  ;;  %846 = vmatpush.bf16.msra.mxu3 %v1759_v6  ;;  %v2110_v1 = vld [vmem:[#allocation5 + $0x14] sm:$0xf]  ;;  %v1720_v22 = vld [vmem:[#allocation5 + $0x18] sm:$0xf0]  ;;  %v1719_v49 = vor.u32 %v2111_v41, %v1718_v8 }
  0xf5   :  { %v282_v15 = vsel %vm280_vm14, %v267_v11, %v281_v18  ;;  %859 = vmatpush.bf16.msrb.mxu0 %v1831_v53  ;;  %v2134_v11 = vld [vmem:[#allocation5 + $0xd4] sm:$0xf]  ;;  %v1790_v6 = vld [vmem:[#allocation5 + $0xa0] sm:$0xf]  ;;  %v2128_v50 = vld [vmem:[#allocation5 + $0xa4] sm:$0xf] }
  0xf6   :  { %v411_v60 = vsel %vm290_vm12, %v410_v54, %v409_v52  ;;  %v286_v30 = vsel %vm279_vm0, %v282_v15, %v285_v20  ;;  %v2670_v52 = vld [vmem:[%s2865_s3] sm:$0x3]  ;;  %v2114_v18 = vld [vmem:[#allocation5 + $0x34] sm:$0xf]  ;;  %v2109_v58 = vld [vmem:[#allocation5 + $0x4] sm:$0xf0] }
  0xf7   :  { %v414_v31 = vsel %vm2647_vm13, %v2496_v14, %v411_v60  ;;  %v287_v37 = vsel %vm276_vm4, nan, %v286_v30  ;;  %v1763_v14 = vor.u32 %v2120_v47, %v1760_v48  ;;  %v1832_v54 = vld [vmem:[#allocation5 + $0xf8] sm:$0xf0]  ;;  %v2118_v60 = vld [vmem:[#allocation5 + $0x54] sm:$0xf]  ;;  %v463_v53 = vperm.slane %v2670_v52, 1 }
  0xf8   :  { %v416_v63 = vmul.f32 %v414_v31, %v414_v31  ;;  %v1835_v55 = vor.u32 %v2138_v51, %v1832_v54  ;;  %847 = vmatpush.bf16.msra.mxu3 %v1751_v29  ;;  %v1726_v20 = vld [vmem:[#allocation5 + $0x20] sm:$0xf]  ;;  %v2129_v48 = vld [vmem:[#allocation5 + $0xa4] sm:$0xf0]  ;;  %v1792_v51 = vld [vmem:[#allocation5 + $0xa8] sm:$0xf0]  ;;  %v1723_v54 = vor.u32 %v2110_v1, %v1720_v22 }
  0xf9   :  { %874 = vmatpush.bf16.msrb.mxu1 %v1763_v14  ;;  %v2108_v29 = vld [vmem:[#allocation5 + $0x4] sm:$0xf] }
  0xfa   :  { %v424_v39 = vmul.f32 -0.00019511016, %v416_v63  ;;  %v417_v7 = vmul.f32 -0.001358992, %v416_v63  ;;  %887 = vmatpush.bf16.msrb.mxu2 %v1835_v55  ;;  %v1710_v55 = vld [vmem:[#allocation5] sm:$0xf] }
  0xfc   :  { %v425_v25 = vadd.f32 0.008332121, %v424_v39  ;;  %v418_v26 = vadd.f32 0.041655596, %v417_v7  ;;  %v462_v39 = vperm.slane %v2670_v52, 0 }
  0xfd   :  { %v1824_v7 = vld [vmem:[#allocation5 + $0xe8] sm:$0xf0] }
  0xfe   :  { %v426_v9 = vmul.f32 %v425_v25, %v416_v63  ;;  %v419_v57 = vmul.f32 %v418_v26, %v416_v63  ;;  %v1827_v2 = vor.u32 %v2136_v36, %v1824_v7  ;;  %v1742_v25 = vld [vmem:[#allocation5 + $0x40] sm:$0xf]  ;;  %v2116_v26 = vld [vmem:[#allocation5 + $0x44] sm:$0xf]  ;;  %v2126_v7 = vld [vmem:[#allocation5 + $0x94] sm:$0xf] }
  0xff   :  { %v1743_v4 = vor.u32 %v2117_v3, %v1742_v25 }
 0x100   :  { %v427_v10 = vadd.f32 -0.16666654, %v426_v9  ;;  %v420_v12 = vadd.f32 -0.4999988, %v419_v57  ;;  %v1814_v9 = vld [vmem:[#allocation5 + $0xd0] sm:$0xf]  ;;  %888 = vmatpush.bf16.msrb.mxu2 %v1827_v2  ;;  %v1747_v57 = vor.u32 %v2116_v26, %v1744_v5 }
 0x101   :  { %848 = vmatpush.bf16.msra.mxu3 %v1743_v4  ;;  %v1784_v2 = vld [vmem:[#allocation5 + $0x98] sm:$0xf0]  ;;  %v2400_v26 = vmov 100.0  }
 0x102   :  { %v428_v17 = vmul.f32 %v427_v10, %v416_v63  ;;  %v421_v43 = vmul.f32 %v420_v12, %v416_v63  ;;  %v1822_v63 = vld [vmem:[#allocation5 + $0xe0] sm:$0xf]  ;;  %v1815_v10 = vor.u32 %v2135_v56, %v1814_v9  ;;  %v1816_v12 = vld [vmem:[#allocation5 + $0xd8] sm:$0xf0]  ;;  %2219 = vrcp.f32 %v2400_v26 }
 0x103   :  { %v1823_v16 = vor.u32 %v2137_v0, %v1822_v63  ;;  %v1819_v13 = vor.u32 %v2134_v11, %v1816_v12  ;;  %v1782_v63 = vld [vmem:[#allocation5 + $0x90] sm:$0xf]  ;;  %v2127_v0 = vld [vmem:[#allocation5 + $0x94] sm:$0xf0]  ;;  %v1774_v12 = vld [vmem:[#allocation5 + $0x80] sm:$0xf] }
 0x104   :  { %v429_v42 = vadd.f32 1.0, %v428_v17  ;;  %v422_v32 = vadd.f32 1.0, %v421_v43  ;;  %v2115_v17 = vld [vmem:[#allocation5 + $0x34] sm:$0xf0]  ;;  %v1736_v43 = vld [vmem:[#allocation5 + $0x38] sm:$0xf0]  ;;  %v1783_v9 = vor.u32 %v2127_v0, %v1782_v63 }
 0x105   :  { %860 = vmatpush.bf16.msrb.mxu0 %v1823_v16  ;;  %v1739_v19 = vor.u32 %v2114_v18, %v1736_v43  ;;  %889 = vmatpush.bf16.msrb.mxu2 %v1819_v13  ;;  %v1711_v16 = vor.u32 %v2109_v58, %v1710_v55  ;;  %v2124_v13 = vld [vmem:[#allocation5 + $0x84] sm:$0xf] }
 0x106   :  { %v430_v23 = vmul.f32 %v429_v42, %v414_v31  ;;  %v439_v24 = vxor.u32 2147483648, %v422_v32  ;;  %v1755_v31 = vor.u32 %v2118_v60, %v1752_v61  ;;  %v1735_v42 = vor.u32 %v2115_v17, %v1734_v62  ;;  %v1712_v61 = vld [vmem:[#allocation5 + $0x8] sm:$0xf0]  ;;  %v2125_v62 = vld [vmem:[#allocation5 + $0x84] sm:$0xf0] }
 0x107   :  { %v1791_v60 = vor.u32 %v2129_v48, %v1790_v6  ;;  %v1715_v3 = vor.u32 %v2108_v29, %v1712_v61  ;;  %v1776_v17 = vld [vmem:[#allocation5 + $0x88] sm:$0xf0] }
 0x108   :  { %v436_v28 = vxor.u32 2147483648, %v430_v23  ;;  %v440_v34 = vsel %vm438_vm2, %v439_v24, %v430_v23  ;;  %875 = vmatpush.bf16.msrb.mxu1 %v1755_v31  ;;  %v2132_v23 = vld [vmem:[#allocation5 + $0xc4] sm:$0xf]  ;;  %v1808_v24 = vld [vmem:[#allocation5 + $0xc8] sm:$0xf0]  ;;  %849 = vmatpush.bf16.msra.mxu3 %v1735_v42  ;;  %v1795_v31 = vor.u32 %v2128_v50, %v1792_v51  ;;  %v1775_v42 = vor.u32 %v2125_v62, %v1774_v12 }
 0x109   :  { %861 = vmatpush.bf16.msrb.mxu0 %v1815_v10  ;;  %v1811_v30 = vor.u32 %v2132_v23, %v1808_v24 }
 0x10a   :  { %v437_v33 = vsel %vm435_vm1, %v422_v32, %v436_v28  ;;  %v1806_v32 = vld [vmem:[#allocation5 + $0xc0] sm:$0xf]  ;;  %v2113_v28 = vld [vmem:[#allocation5 + $0x24] sm:$0xf0] }
 0x10b   :  { %v441_v35 = vsel %vm434_vm3, %v437_v33, %v440_v34  ;;  %v1807_v15 = vor.u32 %v2133_v21, %v1806_v32  ;;  %v2112_v33 = vld [vmem:[#allocation5 + $0x24] sm:$0xf]  ;;  %v1728_v34 = vld [vmem:[#allocation5 + $0x28] sm:$0xf0]  ;;  %890 = vmatpush.bf16.msrb.mxu2 %v1811_v30  ;;  %v1779_v32 = vor.u32 %v2124_v13, %v1776_v17 }
 0x10c   :  { %v442_v45 = vsel %vm431_vm5, nan, %v441_v35  ;;  %876 = vmatpush.bf16.msrb.mxu1 %v1747_v57  ;;  %v1798_v35 = vld [vmem:[#allocation5 + $0xb0] sm:$0xf]  ;;  %v1731_v40 = vor.u32 %v2112_v33, %v1728_v34  ;;  %v1787_v57 = vor.u32 %v2126_v7, %v1784_v2 }
 0x10d   :  { %v443_v27 = vpack.c.bf16 %v442_v45, %v287_v37  ;;  %v1727_v37 = vor.u32 %v2113_v28, %v1726_v20  ;;  %v2131_v45 = vld [vmem:[#allocation5 + $0xb4] sm:$0xf0]  ;;  %862 = vmatpush.bf16.msrb.mxu0 %v1807_v15 }
 0x10e   :  { %v1799_v44 = vor.u32 %v2131_v45, %v1798_v35 }
 0x10f   :  { %554 = vmatmul.bf16.vlgmr.msra.gmra.mxu1 %v443_v27  ;;  %568 = vmatmul.bf16.vlgmr.msra.gmra.mxu2 %v443_v27  ;;  %v2130_v27 = vld [vmem:[#allocation5 + $0xb4] sm:$0xf] }
 0x110   :  { %877 = vmatpush.bf16.msrb.mxu1 %v1739_v19  ;;  %v1803_v47 = vor.u32 %v2130_v27, %v1800_v38  ;;  %850 = vmatpush.bf16.msra.mxu3 %v1727_v37  ;;  %v2220_v19 = vpop.eup %2219 }
 0x111   :  { %863 = vmatpush.bf16.msrb.mxu0 %v1799_v44  ;;  %v631_v20 = vmul.f32 100.0, %v2220_v19  ;;  %vm635_vm6 = vweird.f32 %v2220_v19 }
 0x112   :  { %891 = vmatpush.bf16.msrb.mxu2 %v1803_v47 }
 0x113   :  { %v632_v34 = vsub.f32 1.0, %v631_v20 }
 0x114   :  { %878 = vmatpush.bf16.msrb.mxu1 %v1731_v40  ;;  %851 = vmatpush.bf16.msra.mxu3 %v1719_v49 }
 0x115   :  { %864 = vmatpush.bf16.msrb.mxu0 %v1791_v60  ;;  %v633_v40 = vmul.f32 %v2220_v19, %v632_v34  ;;  %v2170_v34 = vld [vmem:[#allocation7 + $0xf4] sm:$0xf] }
 0x116   :  { %892 = vmatpush.bf16.msrb.mxu2 %v1795_v31 }
 0x117   :  { %v634_v47 = vadd.f32 %v2220_v19, %v633_v40 }
 0x118   :  { %879 = vmatpush.bf16.msrb.mxu1 %v1723_v54  ;;  %852 = vmatpush.bf16.msra.mxu3 %v1711_v16 }
 0x119   :  { %865 = vmatpush.bf16.msrb.mxu0 %v1783_v9  ;;  %v2702_v58 = vsel %vm635_vm6, %v2220_v19, %v634_v47  ;;  %v2155_v19 = vld [vmem:[#allocation7 + $0x74] sm:$0xf0]  ;;  %v1952_v47 = vld [vmem:[#allocation7 + $0xe8] sm:$0xf0] }
 0x11a   :  { %893 = vmatpush.bf16.msrb.mxu2 %v1787_v57 }
 0x11c   :  { %880 = vmatpush.bf16.msrb.mxu1 %v1715_v3 }
 0x11d   :  { %866 = vmatpush.bf16.msrb.mxu0 %v1775_v42 }
 0x11e   :  { %894 = vmatpush.bf16.msrb.mxu2 %v1779_v32  ;;  %v2154_v32 = vld [vmem:[#allocation7 + $0x74] sm:$0xf] }
 0x18c   :  { %v555_v46 = vpop.f32.mrf.mxu1 }
 0x18d   :  { %v2675_v14 = vadd.f32 %v555_v46, %v462_v39 }
 0x18f   :  { %v2679_v59 = vmul.f32 100.0, %v2675_v14 }
 0x191   :  { %v578_v36 = vmin.f32 %v2679_v59, 20.0  ;;  %vm582_vm10 = vcmp.gt.f32.partialorder %v2679_v59, 20.0 }
 0x192   :  { %v569_v25 = vpop.f32.mrf.mxu2 }
 0x193   :  { %v586_v4 = vmul.f32 1.442695, %v578_v36  ;;  %v2682_v5 = vadd.f32 %v569_v25, %v463_v53 }
 0x194   :  { %v557_v56 = vpop.f32.mrf.mxu1 }
 0x195   :  { %2221 = vpow2.f32 %v586_v4  ;;  %v2685_v10 = vmul.f32 100.0, %v2682_v5  ;;  %v2689_v11 = vadd.f32 %v557_v56, %v462_v39 }
 0x197   :  { %v579_v18 = vmin.f32 %v2685_v10, 20.0  ;;  %v2693_v43 = vmul.f32 100.0, %v2689_v11  ;;  %vm583_vm13 = vcmp.gt.f32.partialorder %v2685_v10, 20.0  ;;  %v1958_v10 = vld [vmem:[#allocation7 + $0xf0] sm:$0xf] }
 0x199   :  { %v588_v21 = vmul.f32 1.442695, %v579_v18  ;;  %v580_v52 = vmin.f32 %v2693_v43, 20.0  ;;  %vm584_vm11 = vcmp.gt.f32.partialorder %v2693_v43, 20.0  ;;  %v1894_v43 = vld [vmem:[#allocation7 + $0x70] sm:$0xf] }
 0x19a   :  { %v571_v39 = vpop.f32.mrf.mxu2 }
 0x19b   :  { %v2222_v23 = vpop.eup %2221  ;;  %2223 = vpow2.f32 %v588_v21  ;;  %v590_v15 = vmul.f32 1.442695, %v580_v52  ;;  %v2696_v24 = vadd.f32 %v571_v39, %v463_v53  ;;  %v1895_v21 = vor.u32 %v2155_v19, %v1894_v43  ;;  %v1896_v52 = vld [vmem:[#allocation7 + $0x78] sm:$0xf0] }
 0x19c   :  { %v594_v28 = vadd.f32 1.0, %v2222_v23  ;;  %v597_v45 = vmul.f32 -0.5, %v2222_v23  ;;  %v600_v22 = vand.u32 2147483647, %v2222_v23  ;;  %v1899_v39 = vor.u32 %v2154_v32, %v1896_v52  ;;  %v2163_v32 = vld [vmem:[#allocation7 + $0xb4] sm:$0xf0] }
 0x19d   :  { %2225 = vpow2.f32 %v590_v15  ;;  %v2699_v30 = vmul.f32 100.0, %v2696_v24  ;;  %1165 = vmatpush.bf16.msrb.mxu3 %v1895_v21  ;;  %v2153_v15 = vld [vmem:[#allocation7 + $0x64] sm:$0xf0]  ;;  %v2144_v21 = vld [vmem:[#allocation7 + $0x24] sm:$0xf] }
 0x19e   :  { %2227 = vlog2.f32 %v594_v28  ;;  %v598_v44 = vadd.f32 1.0, %v597_v45  ;;  %vm601_vm7 = vcmp.lt.f32.partialorder %v600_v22, 0.0004427343  ;;  %1193 = vmatpush.bf16.msra.mxu1 %v1899_v39  ;;  %v2171_v28 = vld [vmem:[#allocation7 + $0xf4] sm:$0xf0] }
 0x19f   :  { %v581_v33 = vmin.f32 %v2699_v30, 20.0  ;;  %vm585_vm14 = vcmp.gt.f32.partialorder %v2699_v30, 20.0  ;;  %v2152_v30 = vld [vmem:[#allocation7 + $0x64] sm:$0xf]  ;;  %v1878_v45 = vld [vmem:[#allocation7 + $0x50] sm:$0xf] }
 0x1a0   :  { %v599_v49 = vmul.f32 %v2222_v23, %v598_v44  ;;  %v1886_v23 = vld [vmem:[#allocation7 + $0x60] sm:$0xf]  ;;  %v1880_v44 = vld [vmem:[#allocation7 + $0x58] sm:$0xf0]  ;;  %v1856_v52 = vld [vmem:[#allocation7 + $0x28] sm:$0xf0] }
 0x1a1   :  { %v2224_v35 = vpop.eup %2223  ;;  %v592_v37 = vmul.f32 1.442695, %v581_v33  ;;  %v1887_v20 = vor.u32 %v2153_v15, %v1886_v23  ;;  %v1959_v33 = vor.u32 %v2171_v28, %v1958_v10  ;;  %v1859_v23 = vor.u32 %v2144_v21, %v1856_v52  ;;  %v2162_v15 = vld [vmem:[#allocation7 + $0xb4] sm:$0xf]  ;;  %v1928_v10 = vld [vmem:[#allocation7 + $0xb8] sm:$0xf0] }
 0x1a2   :  { %v603_v27 = vadd.f32 1.0, %v2224_v35  ;;  %v606_v6 = vmul.f32 -0.5, %v2224_v35  ;;  %v609_v31 = vand.u32 2147483647, %v2224_v35  ;;  %v1931_v28 = vor.u32 %v2162_v15, %v1928_v10 }
 0x1a3   :  { %v2226_v38 = vpop.eup %2225  ;;  %2229 = vpow2.f32 %v592_v37  ;;  %1166 = vmatpush.bf16.msrb.mxu3 %v1887_v20  ;;  %1179 = vmatpush.bf16.msra.mxu0 %v1959_v33  ;;  %v1918_v33 = vld [vmem:[#allocation7 + $0xa0] sm:$0xf] }
 0x1a4   :  { %v2228_v8 = vpop.eup %2227  ;;  %v612_v41 = vadd.f32 1.0, %v2226_v38  ;;  %2231 = vlog2.f32 %v603_v27  ;;  %v615_v1 = vmul.f32 -0.5, %v2226_v38  ;;  %v618_v53 = vand.u32 2147483647, %v2226_v38  ;;  %v2151_v27 = vld [vmem:[#allocation7 + $0x54] sm:$0xf0] }
 0x1a5   :  { %v596_v46 = vmul.f32 0.6931472, %v2228_v8  ;;  %v607_v60 = vadd.f32 1.0, %v606_v6  ;;  %vm610_vm9 = vcmp.lt.f32.partialorder %v609_v31, 0.0004427343  ;;  %v1879_v40 = vor.u32 %v2151_v27, %v1878_v45 }
 0x1a6   :  { %2233 = vlog2.f32 %v612_v41  ;;  %v616_v50 = vadd.f32 1.0, %v615_v1  ;;  %vm619_vm8 = vcmp.lt.f32.partialorder %v618_v53, 0.0004427343  ;;  %v2169_v8 = vld [vmem:[#allocation7 + $0xe4] sm:$0xf0] }
 0x1a7   :  { %v602_v55 = vsel %vm601_vm7, %v599_v49, %v596_v46  ;;  %v608_v2 = vmul.f32 %v2224_v35, %v607_v60  ;;  %v1960_v35 = vld [vmem:[#allocation7 + $0xf8] sm:$0xf0]  ;;  %v2150_v41 = vld [vmem:[#allocation7 + $0x54] sm:$0xf]  ;;  %v2168_v46 = vld [vmem:[#allocation7 + $0xe4] sm:$0xf]  ;;  %1167 = vmatpush.bf16.msrb.mxu3 %v1879_v40 }
 0x1a8   :  { %v617_v0 = vmul.f32 %v2226_v38, %v616_v50  ;;  %v637_v16 = vmul.f32 %v2702_v58, %v602_v55  ;;  %v1963_v37 = vor.u32 %v2170_v34, %v1960_v35  ;;  %v1950_v38 = vld [vmem:[#allocation7 + $0xe0] sm:$0xf]  ;;  %v1883_v22 = vor.u32 %v2150_v41, %v1880_v44  ;;  %v2149_v49 = vld [vmem:[#allocation7 + $0x44] sm:$0xf0]  ;;  %v1942_v50 = vld [vmem:[#allocation7 + $0xd0] sm:$0xf] }
 0x1a9   :  { %v2230_v48 = vpop.eup %2229  ;;  %v1951_v1 = vor.u32 %v2169_v8, %v1950_v38  ;;  %v1955_v6 = vor.u32 %v2168_v46, %v1952_v47  ;;  %v2167_v53 = vld [vmem:[#allocation7 + $0xd4] sm:$0xf0]  ;;  %v1872_v55 = vld [vmem:[#allocation7 + $0x48] sm:$0xf0]  ;;  %v2719_v60 = vld [vmem:[%s2867_s5] sm:$0x3] }
 0x1aa   :  { %v2232_v51 = vpop.eup %2231  ;;  %v621_v54 = vadd.f32 1.0, %v2230_v48  ;;  %v624_v29 = vmul.f32 -0.5, %v2230_v48  ;;  %v627_v26 = vand.u32 2147483647, %v2230_v48  ;;  %v641_v56 = vsel %vm582_vm10, %v2675_v14, %v637_v16  ;;  %1207 = vmatpush.bf16.msra.mxu2 %v1963_v37  ;;  %v2166_v31 = vld [vmem:[#allocation7 + $0xd4] sm:$0xf] }
 0x1ab   :  { %v605_v36 = vmul.f32 0.6931472, %v2232_v51  ;;  %1180 = vmatpush.bf16.msra.mxu0 %v1951_v1  ;;  %v1862_v16 = vld [vmem:[#allocation7 + $0x30] sm:$0xf]  ;;  %v2161_v37 = vld [vmem:[#allocation7 + $0xa4] sm:$0xf0] }
 0x1ac   :  { %v2234_v61 = vpop.eup %2233  ;;  %2235 = vlog2.f32 %v621_v54  ;;  %v625_v25 = vadd.f32 1.0, %v624_v29  ;;  %vm628_vm12 = vcmp.lt.f32.partialorder %v627_v26, 0.0004427343  ;;  %v2148_v54 = vld [vmem:[#allocation7 + $0x44] sm:$0xf]  ;;  %v1943_v29 = vor.u32 %v2167_v53, %v1942_v50 }
 0x1ad   :  { %v614_v63 = vmul.f32 0.6931472, %v2234_v61  ;;  %v611_v4 = vsel %vm610_vm9, %v608_v2, %v605_v36  ;;  %v1875_v61 = vor.u32 %v2148_v54, %v1872_v55  ;;  %v1934_v2 = vld [vmem:[#allocation7 + $0xc0] sm:$0xf]  ;;  %v2146_v26 = vld [vmem:[#allocation7 + $0x34] sm:$0xf]  ;;  %v1919_v38 = vor.u32 %v2161_v37, %v1918_v33 }
 0x1ae   :  { %v626_v13 = vmul.f32 %v2230_v48, %v625_v25  ;;  %v638_v17 = vmul.f32 %v2702_v58, %v611_v4  ;;  %v1870_v48 = vld [vmem:[#allocation7 + $0x40] sm:$0xf]  ;;  %1208 = vmatpush.bf16.msra.mxu2 %v1955_v6  ;;  %v1864_v4 = vld [vmem:[#allocation7 + $0x38] sm:$0xf0]  ;;  %v2142_v45 = vld [vmem:[#allocation7 + $0x14] sm:$0xf] }
 0x1af   :  { %v620_v7 = vsel %vm619_vm8, %v617_v0, %v614_v63  ;;  %v1871_v51 = vor.u32 %v2149_v49, %v1870_v48  ;;  %v1944_v63 = vld [vmem:[#allocation7 + $0xd8] sm:$0xf0]  ;;  %v681_v0 = vperm.slane %v2719_v60, 0  ;;  %1181 = vmatpush.bf16.msra.mxu0 %v1943_v29  ;;  %v2160_v8 = vld [vmem:[#allocation7 + $0xa4] sm:$0xf] }
 0x1b0   :  { %v639_v3 = vmul.f32 %v2702_v58, %v620_v7  ;;  %v642_v59 = vsel %vm583_vm13, %v2682_v5, %v638_v17  ;;  %v1888_v5 = vld [vmem:[#allocation7 + $0x68] sm:$0xf0]  ;;  %v1947_v36 = vor.u32 %v2166_v31, %v1944_v63  ;;  %v2147_v7 = vld [vmem:[#allocation7 + $0x34] sm:$0xf0]  ;;  %v1848_v40 = vld [vmem:[#allocation7 + $0x18] sm:$0xf0] }
 0x1b1   :  { %1168 = vmatpush.bf16.msrb.mxu3 %v1871_v51  ;;  %v1863_v25 = vor.u32 %v2147_v7, %v1862_v16  ;;  %v1920_v41 = vld [vmem:[#allocation7 + $0xa8] sm:$0xf0]  ;;  %v1838_v6 = vld [vmem:[#allocation7] sm:$0xf]  ;;  %v2141_v48 = vld [vmem:[#allocation7 + $0x4] sm:$0xf0] }
 0x1b2   :  { %v2236_v9 = vpop.eup %2235  ;;  %v643_v57 = vsel %vm584_vm11, %v2689_v11, %v639_v3  ;;  %1209 = vmatpush.bf16.msra.mxu2 %v1947_v36  ;;  %v2165_v3 = vld [vmem:[#allocation7 + $0xc4] sm:$0xf0]  ;;  %v1923_v47 = vor.u32 %v2160_v8, %v1920_v41  ;;  %v1910_v49 = vld [vmem:[#allocation7 + $0x90] sm:$0xf]  ;;  %v1839_v54 = vor.u32 %v2141_v48, %v1838_v6  ;;  %v2159_v55 = vld [vmem:[#allocation7 + $0x94] sm:$0xf0] }
 0x1b3   :  { %v645_v12 = vpack.c.bf16 %v643_v57, %v641_v56  ;;  %v623_v62 = vmul.f32 0.6931472, %v2236_v9  ;;  %v1935_v9 = vor.u32 %v2165_v3, %v1934_v2  ;;  %v1867_v56 = vor.u32 %v2146_v26, %v1864_v4  ;;  %v2164_v57 = vld [vmem:[#allocation7 + $0xc4] sm:$0xf]  ;;  %v1840_v36 = vld [vmem:[#allocation7 + $0x8] sm:$0xf0] }
 0x1b4   :  { %v1911_v31 = vor.u32 %v2159_v55, %v1910_v49  ;;  %v2140_v63 = vld [vmem:[#allocation7 + $0x4] sm:$0xf]  ;;  %v2158_v16 = vld [vmem:[#allocation7 + $0x94] sm:$0xf]  ;;  %v1902_v26 = vld [vmem:[#allocation7 + $0x80] sm:$0xf] }
 0x1b5   :  { %853 = vmatmul.bf16.vlgmr.msra.gmra.mxu3 %v645_v12  ;;  %881 = vmatmul.bf16.vlgmr.msrb.gmra.mxu1 %v645_v12  ;;  %v629_v18 = vsel %vm628_vm12, %v626_v13, %v623_v62  ;;  %v1936_v12 = vld [vmem:[#allocation7 + $0xc8] sm:$0xf0]  ;;  %v682_v62 = vperm.slane %v2719_v60, 1  ;;  %v1843_v3 = vor.u32 %v2140_v63, %v1840_v36  ;;  %v2157_v4 = vld [vmem:[#allocation7 + $0x84] sm:$0xf0] }
 0x1b6   :  { %v640_v42 = vmul.f32 %v2702_v58, %v629_v18  ;;  %1169 = vmatpush.bf16.msrb.mxu3 %v1863_v25  ;;  %v1939_v17 = vor.u32 %v2164_v57, %v1936_v12  ;;  %1182 = vmatpush.bf16.msra.mxu0 %v1935_v9  ;;  %v1912_v25 = vld [vmem:[#allocation7 + $0x98] sm:$0xf0]  ;;  %v2156_v9 = vld [vmem:[#allocation7 + $0x84] sm:$0xf] }
 0x1b8   :  { %v644_v14 = vsel %vm585_vm14, %v2696_v24, %v640_v42  ;;  %v1891_v24 = vor.u32 %v2152_v30, %v1888_v5  ;;  %1210 = vmatpush.bf16.msra.mxu2 %v1939_v17  ;;  %v1846_v30 = vld [vmem:[#allocation7 + $0x10] sm:$0xf]  ;;  %v2143_v5 = vld [vmem:[#allocation7 + $0x14] sm:$0xf0]  ;;  %v1904_v17 = vld [vmem:[#allocation7 + $0x88] sm:$0xf0] }
 0x1b9   :  { %v646_v11 = vpack.c.bf16 %v644_v14, %v642_v59  ;;  %v1854_v59 = vld [vmem:[#allocation7 + $0x20] sm:$0xf]  ;;  %v2145_v14 = vld [vmem:[#allocation7 + $0x24] sm:$0xf0]  ;;  %v1847_v35 = vor.u32 %v2143_v5, %v1846_v30 }
 0x1ba   :  { %1194 = vmatpush.bf16.msra.mxu1 %v1891_v24  ;;  %v1855_v19 = vor.u32 %v2145_v14, %v1854_v59 }
 0x1bb   :  { %867 = vmatmul.bf16.vlgmr.msrb.gmra.mxu0 %v646_v11  ;;  %895 = vmatmul.bf16.vlgmr.msrb.gmra.mxu2 %v646_v11  ;;  %v1926_v11 = vld [vmem:[#allocation7 + $0xb0] sm:$0xf] }
 0x1bc   :  { %v1927_v39 = vor.u32 %v2163_v32, %v1926_v11  ;;  %1170 = vmatpush.bf16.msrb.mxu3 %v1855_v19  ;;  %1211 = vmatpush.bf16.msra.mxu2 %v1931_v28 }
 0x1be   :  { %1195 = vmatpush.bf16.msra.mxu1 %v1883_v22  ;;  %1183 = vmatpush.bf16.msra.mxu0 %v1927_v39  ;;  %v1851_v22 = vor.u32 %v2142_v45, %v1848_v40 }
 0x1c0   :  { %1171 = vmatpush.bf16.msrb.mxu3 %v1847_v35  ;;  %1212 = vmatpush.bf16.msra.mxu2 %v1923_v47 }
 0x1c2   :  { %1196 = vmatpush.bf16.msra.mxu1 %v1875_v61  ;;  %1184 = vmatpush.bf16.msra.mxu0 %v1919_v38 }
 0x1c4   :  { %1172 = vmatpush.bf16.msrb.mxu3 %v1839_v54 }
 0x1c6   :  { %1197 = vmatpush.bf16.msra.mxu1 %v1867_v56  ;;  %1185 = vmatpush.bf16.msra.mxu0 %v1911_v31 }
 0x1ca   :  { %1198 = vmatpush.bf16.msra.mxu1 %v1859_v23 }
 0x1ce   :  { %1199 = vmatpush.bf16.msra.mxu1 %v1851_v22 }
 0x1d2   :  { %1200 = vmatpush.bf16.msra.mxu1 %v1843_v3 }
 0x232   :  { %v882_v13 = vpop.f32.mrf.mxu1 }
 0x233   :  { %v883_v24 = vadd.f32 %v882_v13, %v682_v62  ;;  %v1903_v13 = vor.u32 %v2157_v4, %v1902_v26 }
 0x235   :  { %1186 = vmatpush.bf16.msra.mxu0 %v1903_v13 }
 0x238   :  { %v854_v18 = vpop.f32.mrf.mxu3  ;;  %v868_v42 = vpop.f32.mrf.mxu0 }
 0x239   :  { %v855_v43 = vadd.f32 %v854_v18, %v681_v0 }
 0x23a   :  { %v884_v29 = vpop.f32.mrf.mxu1 }
 0x23b   :  { %v2725_v20 = vadd.f32 %v868_v42, %v855_v43  ;;  %v885_v56 = vadd.f32 %v884_v29, %v682_v62  ;;  %v1907_v42 = vor.u32 %v2156_v9, %v1904_v17  ;;  %v2086_v17 = vld [vmem:[#allocation8 + $0xf0] sm:$0xf] }
 0x23d   :  { %v2730_v34 = vmul.f32 100.0, %v2725_v20 }
 0x23e   :  { %v896_v27 = vpop.f32.mrf.mxu2 }
 0x23f   :  { %v905_v44 = vmin.f32 %v2730_v34, 20.0  ;;  %v2733_v1 = vadd.f32 %v896_v27, %v883_v24  ;;  %vm909_vm2 = vcmp.gt.f32.partialorder %v2730_v34, 20.0 }
 0x240   :  { %v856_v46 = vpop.f32.mrf.mxu3  ;;  %v870_v61 = vpop.f32.mrf.mxu0 }
 0x241   :  { %v913_v50 = vmul.f32 1.442695, %v905_v44  ;;  %v2736_v51 = vmul.f32 100.0, %v2733_v1  ;;  %v857_v53 = vadd.f32 %v856_v46, %v681_v0  ;;  %v1915_v0 = vor.u32 %v2158_v16, %v1912_v25 }
 0x243   :  { %2237 = vpow2.f32 %v913_v50  ;;  %v906_v7 = vmin.f32 %v2736_v51, 20.0  ;;  %v2741_v2 = vadd.f32 %v870_v61, %v857_v53  ;;  %1213 = vmatpush.bf16.msra.mxu2 %v1915_v0  ;;  %vm910_vm5 = vcmp.gt.f32.partialorder %v2736_v51, 20.0  ;;  %v2202_v51 = vld [vmem:[#allocation8 + $0xf4] sm:$0xf] }
 0x245   :  { %v915_v57 = vmul.f32 1.442695, %v906_v7  ;;  %v2746_v12 = vmul.f32 100.0, %v2741_v2 }
 0x246   :  { %v898_v18 = vpop.f32.mrf.mxu2 }
 0x247   :  { %2239 = vpow2.f32 %v915_v57  ;;  %v907_v59 = vmin.f32 %v2746_v12, 20.0  ;;  %v2749_v14 = vadd.f32 %v898_v18, %v885_v56  ;;  %1214 = vmatpush.bf16.msra.mxu2 %v1907_v42  ;;  %vm911_vm3 = vcmp.gt.f32.partialorder %v2746_v12, 20.0  ;;  %v2187_v56 = vld [vmem:[#allocation8 + $0x74] sm:$0xf0]  ;;  %v2024_v12 = vld [vmem:[#allocation8 + $0x78] sm:$0xf0] }
 0x248   :  { %v2203_v18 = vld [vmem:[#allocation8 + $0xf4] sm:$0xf0] }
 0x249   :  { %v2238_v11 = vpop.eup %2237  ;;  %v917_v43 = vmul.f32 1.442695, %v907_v59  ;;  %v2752_v60 = vmul.f32 100.0, %v2749_v14  ;;  %v2087_v42 = vor.u32 %v2203_v18, %v2086_v17  ;;  %v2088_v59 = vld [vmem:[#allocation8 + $0xf8] sm:$0xf0] }
 0x24a   :  { %v921_v62 = vadd.f32 1.0, %v2238_v11  ;;  %v924_v39 = vmul.f32 -0.5, %v2238_v11  ;;  %v927_v33 = vand.u32 2147483647, %v2238_v11 }
 0x24b   :  { %2241 = vpow2.f32 %v917_v43  ;;  %v908_v19 = vmin.f32 %v2752_v60, 20.0  ;;  %vm912_vm6 = vcmp.gt.f32.partialorder %v2752_v60, 20.0  ;;  %v2185_v43 = vld [vmem:[#allocation8 + $0x64] sm:$0xf0]  ;;  %1499 = vmatpush.bf16.msrb.mxu0 %v2087_v42 }
 0x24c   :  { %2243 = vlog2.f32 %v921_v62  ;;  %v925_v30 = vadd.f32 1.0, %v924_v39  ;;  %vm928_vm15 = vcmp.lt.f32.partialorder %v927_v33, 0.0004427343  ;;  %v2016_v62 = vld [vmem:[#allocation8 + $0x68] sm:$0xf0] }
 0x24d   :  { %v2240_v32 = vpop.eup %2239  ;;  %v919_v21 = vmul.f32 1.442695, %v908_v19  ;;  %v2008_v33 = vld [vmem:[#allocation8 + $0x58] sm:$0xf0] }
 0x24e   :  { %v930_v52 = vadd.f32 1.0, %v2240_v32  ;;  %v933_v28 = vmul.f32 -0.5, %v2240_v32  ;;  %v926_v40 = vmul.f32 %v2238_v11, %v925_v30  ;;  %v936_v41 = vand.u32 2147483647, %v2240_v32  ;;  %v2182_v30 = vld [vmem:[#allocation8 + $0x54] sm:$0xf] }
 0x24f   :  { %2245 = vpow2.f32 %v919_v21  ;;  %v2091_v11 = vor.u32 %v2202_v51, %v2088_v59  ;;  %v2201_v21 = vld [vmem:[#allocation8 + $0xe4] sm:$0xf0]  ;;  %v1984_v51 = vld [vmem:[#allocation8 + $0x28] sm:$0xf0]  ;;  %v2046_v59 = vld [vmem:[#allocation8 + $0xa0] sm:$0xf] }
 0x250   :  { %2247 = vlog2.f32 %v930_v52  ;;  %v934_v27 = vadd.f32 1.0, %v933_v28  ;;  %vm937_vm0 = vcmp.lt.f32.partialorder %v936_v41, 0.0004427343  ;;  %v2200_v52 = vld [vmem:[#allocation8 + $0xe4] sm:$0xf] }
 0x251   :  { %v2242_v23 = vpop.eup %2241  ;;  %1527 = vmatpush.bf16.msrb.mxu2 %v2091_v11  ;;  %v2183_v28 = vld [vmem:[#allocation8 + $0x54] sm:$0xf0]  ;;  %v2181_v41 = vld [vmem:[#allocation8 + $0x44] sm:$0xf0] }
 0x252   :  { %v2244_v15 = vpop.eup %2243  ;;  %v939_v10 = vadd.f32 1.0, %v2242_v23  ;;  %v942_v5 = vmul.f32 -0.5, %v2242_v23  ;;  %v945_v44 = vand.u32 2147483647, %v2242_v23  ;;  %v935_v6 = vmul.f32 %v2240_v32, %v934_v27  ;;  %v2078_v32 = vld [vmem:[#allocation8 + $0xe0] sm:$0xf] }
 0x253   :  { %v923_v35 = vmul.f32 0.6931472, %v2244_v15  ;;  %v2079_v39 = vor.u32 %v2201_v21, %v2078_v32  ;;  %v2193_v11 = vld [vmem:[#allocation8 + $0xa4] sm:$0xf0]  ;;  %v1974_v21 = vld [vmem:[#allocation8 + $0x10] sm:$0xf] }
 0x254   :  { %2249 = vlog2.f32 %v939_v10  ;;  %v943_v8 = vadd.f32 1.0, %v942_v5  ;;  %vm946_vm1 = vcmp.lt.f32.partialorder %v945_v44, 0.0004427343  ;;  %v2006_v10 = vld [vmem:[#allocation8 + $0x50] sm:$0xf] }
 0x255   :  { %v2246_v24 = vpop.eup %2245  ;;  %v929_v46 = vsel %vm928_vm15, %v926_v40, %v923_v35  ;;  %1500 = vmatpush.bf16.msrb.mxu0 %v2079_v39  ;;  %v2007_v5 = vor.u32 %v2183_v28, %v2006_v10  ;;  %v2070_v35 = vld [vmem:[#allocation8 + $0xd0] sm:$0xf]  ;;  %v2180_v44 = vld [vmem:[#allocation8 + $0x44] sm:$0xf]  ;;  %v2174_v39 = vld [vmem:[#allocation8 + $0x14] sm:$0xf] }
 0x256   :  { %v2248_v37 = vpop.eup %2247  ;;  %v948_v45 = vadd.f32 1.0, %v2246_v24  ;;  %v951_v38 = vmul.f32 -0.5, %v2246_v24  ;;  %v944_v50 = vmul.f32 %v2242_v23, %v943_v8  ;;  %v954_v53 = vand.u32 2147483647, %v2246_v24  ;;  %v2080_v23 = vld [vmem:[#allocation8 + $0xe8] sm:$0xf0] }
 0x257   :  { %v932_v22 = vmul.f32 0.6931472, %v2248_v37  ;;  %v957_v54 = vmul.f32 %v929_v46, %v2702_v58  ;;  %v2083_v15 = vor.u32 %v2200_v52, %v2080_v23  ;;  %v2199_v37 = vld [vmem:[#allocation8 + $0xd4] sm:$0xf0]  ;;  %v1998_v8 = vld [vmem:[#allocation8 + $0x40] sm:$0xf] }
 0x258   :  { %2251 = vlog2.f32 %v948_v45  ;;  %v952_v48 = vadd.f32 1.0, %v951_v38  ;;  %vm955_vm4 = vcmp.lt.f32.partialorder %v954_v53, 0.0004427343  ;;  %v2198_v45 = vld [vmem:[#allocation8 + $0xd4] sm:$0xf]  ;;  %v2071_v27 = vor.u32 %v2199_v37, %v2070_v35 }
 0x259   :  { %v938_v55 = vsel %vm937_vm0, %v935_v6, %v932_v22  ;;  %v961_v7 = vsel %vm909_vm2, %v2725_v20, %v957_v54  ;;  %v2022_v20 = vld [vmem:[#allocation8 + $0x70] sm:$0xf]  ;;  %1528 = vmatpush.bf16.msrb.mxu2 %v2083_v15  ;;  %v2072_v38 = vld [vmem:[#allocation8 + $0xd8] sm:$0xf0]  ;;  %v1999_v22 = vor.u32 %v2181_v41, %v1998_v8  ;;  %v2000_v46 = vld [vmem:[#allocation8 + $0x48] sm:$0xf0] }
 0x25a   :  { %v2250_v47 = vpop.eup %2249  ;;  %v953_v36 = vmul.f32 %v2246_v24, %v952_v48  ;;  %v958_v16 = vmul.f32 %v938_v55, %v2702_v58  ;;  %v2023_v57 = vor.u32 %v2187_v56, %v2022_v20  ;;  %v2011_v24 = vor.u32 %v2182_v30, %v2008_v33  ;;  %1501 = vmatpush.bf16.msrb.mxu0 %v2071_v27  ;;  %v2062_v6 = vld [vmem:[#allocation8 + $0xc0] sm:$0xf]  ;;  %v2197_v48 = vld [vmem:[#allocation8 + $0xc4] sm:$0xf0]  ;;  %v2064_v54 = vld [vmem:[#allocation8 + $0xc8] sm:$0xf0] }
 0x25b   :  { %v941_v49 = vmul.f32 0.6931472, %v2250_v47  ;;  %v2075_v40 = vor.u32 %v2198_v45, %v2072_v38  ;;  %v2003_v47 = vor.u32 %v2180_v44, %v2000_v46  ;;  %v2063_v53 = vor.u32 %v2197_v48, %v2062_v6  ;;  %v2175_v52 = vld [vmem:[#allocation8 + $0x14] sm:$0xf0]  ;;  %v1976_v28 = vld [vmem:[#allocation8 + $0x18] sm:$0xf0] }
 0x25c   :  { %v962_v34 = vsel %vm910_vm5, %v2733_v1, %v958_v16  ;;  %1485 = vmatpush.bf16.msra.mxu3 %v2023_v57  ;;  %v2014_v1 = vld [vmem:[#allocation8 + $0x60] sm:$0xf]  ;;  %v1975_v10 = vor.u32 %v2175_v52, %v1974_v21  ;;  %v1979_v30 = vor.u32 %v2174_v39, %v1976_v28  ;;  %v2191_v33 = vld [vmem:[#allocation8 + $0x94] sm:$0xf0]  ;;  %v2040_v38 = vld [vmem:[#allocation8 + $0x98] sm:$0xf0] }
 0x25d   :  { %v947_v29 = vsel %vm946_vm1, %v944_v50, %v941_v49  ;;  %v2015_v60 = vor.u32 %v2185_v43, %v2014_v1  ;;  %1529 = vmatpush.bf16.msrb.mxu2 %v2075_v40  ;;  %v2196_v49 = vld [vmem:[#allocation8 + $0xc4] sm:$0xf]  ;;  %v2770_v50 = vld [vmem:[%s2869_s7] sm:$0x3]  ;;  %v2173_v44 = vld [vmem:[#allocation8 + $0x4] sm:$0xf0] }
 0x25e   :  { %v2252_v61 = vpop.eup %2251  ;;  %v959_v31 = vmul.f32 %v947_v29, %v2702_v58  ;;  %v2067_v55 = vor.u32 %v2196_v49, %v2064_v54  ;;  %v1990_v29 = vld [vmem:[#allocation8 + $0x30] sm:$0xf]  ;;  %1502 = vmatpush.bf16.msrb.mxu0 %v2063_v53  ;;  %v1982_v57 = vld [vmem:[#allocation8 + $0x20] sm:$0xf]  ;;  %v2192_v1 = vld [vmem:[#allocation8 + $0xa4] sm:$0xf] }
 0x25f   :  { %v950_v63 = vmul.f32 0.6931472, %v2252_v61  ;;  %v2179_v61 = vld [vmem:[#allocation8 + $0x34] sm:$0xf0]  ;;  %v1966_v41 = vld [vmem:[#allocation8] sm:$0xf] }
 0x260   :  { %v963_v25 = vsel %vm911_vm3, %v2741_v2, %v959_v31  ;;  %v2186_v2 = vld [vmem:[#allocation8 + $0x74] sm:$0xf]  ;;  %1486 = vmatpush.bf16.msra.mxu3 %v2015_v60  ;;  %v1991_v16 = vor.u32 %v2179_v61, %v1990_v29  ;;  %v2047_v60 = vor.u32 %v2193_v11, %v2046_v59  ;;  %v1968_v48 = vld [vmem:[#allocation8 + $0x8] sm:$0xf0]  ;;  %v1967_v54 = vor.u32 %v2173_v44, %v1966_v41  ;;  %v2030_v29 = vld [vmem:[#allocation8 + $0x80] sm:$0xf] }
 0x261   :  { %v956_v3 = vsel %vm955_vm4, %v953_v36, %v950_v63  ;;  %v965_v0 = vpack.c.bf16 %v963_v25, %v961_v7  ;;  %v2027_v13 = vor.u32 %v2186_v2, %v2024_v12  ;;  %v2178_v31 = vld [vmem:[#allocation8 + $0x34] sm:$0xf]  ;;  %v1001_v36 = vperm.slane %v2770_v50, 0  ;;  %v1992_v7 = vld [vmem:[#allocation8 + $0x38] sm:$0xf0]  ;;  %1530 = vmatpush.bf16.msrb.mxu2 %v2067_v55 }
 0x262   :  { %v960_v26 = vmul.f32 %v956_v3, %v2702_v58  ;;  %v1995_v25 = vor.u32 %v2178_v31, %v1992_v7  ;;  %v2054_v3 = vld [vmem:[#allocation8 + $0xb0] sm:$0xf]  ;;  %v2177_v12 = vld [vmem:[#allocation8 + $0x24] sm:$0xf0]  ;;  %v2188_v31 = vld [vmem:[#allocation8 + $0x84] sm:$0xf] }
 0x263   :  { %1173 = vmatmul.bf16.vlgmr.msrb.gmra.mxu3 %v965_v0  ;;  %1201 = vmatmul.bf16.vlgmr.msra.gmra.mxu1 %v965_v0  ;;  %v2195_v0 = vld [vmem:[#allocation8 + $0xb4] sm:$0xf0]  ;;  %v1983_v18 = vor.u32 %v2177_v12, %v1982_v57  ;;  %v2189_v61 = vld [vmem:[#allocation8 + $0x84] sm:$0xf0] }
 0x264   :  { %v964_v4 = vsel %vm912_vm6, %v2749_v14, %v960_v26  ;;  %1513 = vmatpush.bf16.msrb.mxu1 %v2027_v13  ;;  %v2184_v14 = vld [vmem:[#allocation8 + $0x64] sm:$0xf]  ;;  %1487 = vmatpush.bf16.msra.mxu3 %v2007_v5  ;;  %v2194_v26 = vld [vmem:[#allocation8 + $0xb4] sm:$0xf]  ;;  %v2038_v5 = vld [vmem:[#allocation8 + $0x90] sm:$0xf]  ;;  %v2031_v7 = vor.u32 %v2189_v61, %v2030_v29 }
 0x265   :  { %v966_v9 = vpack.c.bf16 %v964_v4, %v962_v34  ;;  %v2019_v19 = vor.u32 %v2184_v14, %v2016_v62  ;;  %v1002_v34 = vperm.slane %v2770_v50, 1  ;;  %v2055_v4 = vor.u32 %v2195_v0, %v2054_v3  ;;  %v2176_v13 = vld [vmem:[#allocation8 + $0x24] sm:$0xf]  ;;  %v2048_v62 = vld [vmem:[#allocation8 + $0xa8] sm:$0xf0] }
 0x266   :  { %v1987_v42 = vor.u32 %v2176_v13, %v1984_v51  ;;  %v2051_v32 = vor.u32 %v2192_v1, %v2048_v62  ;;  %v2039_v27 = vor.u32 %v2191_v33, %v2038_v5 }
 0x267   :  { %1187 = vmatmul.bf16.vlgmr.msra.gmra.mxu0 %v966_v9  ;;  %1215 = vmatmul.bf16.vlgmr.msra.gmra.mxu2 %v966_v9  ;;  %v2056_v9 = vld [vmem:[#allocation8 + $0xb8] sm:$0xf0] }
 0x268   :  { %1514 = vmatpush.bf16.msrb.mxu1 %v2019_v19  ;;  %1488 = vmatpush.bf16.msra.mxu3 %v1999_v22  ;;  %v2059_v2 = vor.u32 %v2194_v26, %v2056_v9  ;;  %v2172_v22 = vld [vmem:[#allocation8 + $0x4] sm:$0xf] }
 0x269   :  { %1503 = vmatpush.bf16.msrb.mxu0 %v2055_v4  ;;  %v1971_v55 = vor.u32 %v2172_v22, %v1968_v48 }
 0x26a   :  { %1531 = vmatpush.bf16.msrb.mxu2 %v2059_v2 }
 0x26c   :  { %1515 = vmatpush.bf16.msrb.mxu1 %v2011_v24  ;;  %1489 = vmatpush.bf16.msra.mxu3 %v1991_v16  ;;  %v2190_v24 = vld [vmem:[#allocation8 + $0x94] sm:$0xf] }
 0x26d   :  { %1504 = vmatpush.bf16.msrb.mxu0 %v2047_v60  ;;  %v2043_v8 = vor.u32 %v2190_v24, %v2040_v38 }
 0x26e   :  { %1532 = vmatpush.bf16.msrb.mxu2 %v2051_v32 }
 0x270   :  { %1516 = vmatpush.bf16.msrb.mxu1 %v2003_v47  ;;  %1490 = vmatpush.bf16.msra.mxu3 %v1983_v18 }
 0x271   :  { %1505 = vmatpush.bf16.msrb.mxu0 %v2039_v27 }
 0x272   :  { %1533 = vmatpush.bf16.msrb.mxu2 %v2043_v8 }
 0x274   :  { %1517 = vmatpush.bf16.msrb.mxu1 %v1995_v25  ;;  %1491 = vmatpush.bf16.msra.mxu3 %v1975_v10  ;;  %v2032_v25 = vld [vmem:[#allocation8 + $0x88] sm:$0xf0] }
 0x275   :  { %v2035_v50 = vor.u32 %v2188_v31, %v2032_v25  ;;  %1506 = vmatpush.bf16.msrb.mxu0 %v2031_v7 }
 0x277   :  { %1534 = vmatpush.bf16.msrb.mxu2 %v2035_v50 }
 0x278   :  { %1518 = vmatpush.bf16.msrb.mxu1 %v1987_v42  ;;  %1492 = vmatpush.bf16.msra.mxu3 %v1967_v54 }
 0x27c   :  { %1519 = vmatpush.bf16.msrb.mxu1 %v1979_v30 }
 0x280   :  { %1520 = vmatpush.bf16.msrb.mxu1 %v1971_v55 }
 0x2e0   :  { %v1202_v63 = vpop.f32.mrf.mxu1 }
 0x2e1   :  { %v1203_v43 = vadd.f32 %v1202_v63, %v1002_v34 }
 0x2e4   :  { %v1188_v20 = vpop.f32.mrf.mxu0 }
 0x2e6   :  { %v1174_v56 = vpop.f32.mrf.mxu3 }
 0x2e7   :  { %v1175_v17 = vadd.f32 %v1174_v56, %v1001_v36 }
 0x2e8   :  { %v1204_v37 = vpop.f32.mrf.mxu1 }
 0x2e9   :  { %v2776_v14 = vadd.f32 %v1188_v20, %v1175_v17  ;;  %v1205_v49 = vadd.f32 %v1204_v37, %v1002_v34 }
 0x2ea   :  { %v1216_v19 = vpop.f32.mrf.mxu2 }
 0x2eb   :  { %v2779_v23 = vmul.f32 100.0, %v2776_v14  ;;  %v2781_v15 = vadd.f32 %v1216_v19, %v1203_v43 }
 0x2ec   :  { %v1190_v53 = vpop.f32.mrf.mxu0 }
 0x2ed   :  { %v1225_v35 = vmin.f32 %v2779_v23, 20.0  ;;  %v2785_v45 = vmul.f32 100.0, %v2781_v15  ;;  %vm1229_vm11 = vcmp.gt.f32.partialorder %v2779_v23, 20.0 }
 0x2ee   :  { %v1176_v40 = vpop.f32.mrf.mxu3 }
 0x2ef   :  { %v1233_v46 = vmul.f32 1.442695, %v1225_v35  ;;  %v1226_v47 = vmin.f32 %v2785_v45, 20.0  ;;  %v1177_v6 = vadd.f32 %v1176_v40, %v1001_v36  ;;  %vm1230_vm13 = vcmp.gt.f32.partialorder %v2785_v45, 20.0 }
 0x2f1   :  { %2253 = vpow2.f32 %v1233_v46  ;;  %v1235_v63 = vmul.f32 1.442695, %v1226_v47  ;;  %v2790_v16 = vadd.f32 %v1190_v53, %v1177_v6 }
 0x2f2   :  { %v1218_v3 = vpop.f32.mrf.mxu2 }
 0x2f3   :  { %2255 = vpow2.f32 %v1235_v63  ;;  %v2793_v36 = vmul.f32 100.0, %v2790_v16  ;;  %v2795_v0 = vadd.f32 %v1218_v3, %v1205_v49 }
 0x2f5   :  { %v1227_v26 = vmin.f32 %v2793_v36, 20.0  ;;  %v2799_v34 = vmul.f32 100.0, %v2795_v0  ;;  %vm1231_vm12 = vcmp.gt.f32.partialorder %v2793_v36, 20.0 }
 0x2f7   :  { %v2254_v4 = vpop.eup %2253  ;;  %v1237_v9 = vmul.f32 1.442695, %v1227_v26  ;;  %v1228_v20 = vmin.f32 %v2799_v34, 20.0  ;;  %vm1232_vm14 = vcmp.gt.f32.partialorder %v2799_v34, 20.0 }
 0x2f8   :  { %v1241_v56 = vadd.f32 1.0, %v2254_v4  ;;  %v1244_v13 = vmul.f32 -0.5, %v2254_v4  ;;  %v1247_v60 = vand.u32 2147483647, %v2254_v4 }
 0x2f9   :  { %v2256_v2 = vpop.eup %2255  ;;  %2257 = vpow2.f32 %v1237_v9  ;;  %v1239_v57 = vmul.f32 1.442695, %v1228_v20 }
 0x2fa   :  { %2259 = vlog2.f32 %v1241_v56  ;;  %v1250_v12 = vadd.f32 1.0, %v2256_v2  ;;  %v1253_v18 = vmul.f32 -0.5, %v2256_v2  ;;  %v1245_v11 = vadd.f32 1.0, %v1244_v13 }
 0x2fb   :  { %2261 = vpow2.f32 %v1239_v57  ;;  %v1256_v52 = vand.u32 2147483647, %v2256_v2  ;;  %vm1248_vm7 = vcmp.lt.f32.partialorder %v1247_v60, 0.0004427343 }
 0x2fc   :  { %2263 = vlog2.f32 %v1250_v12  ;;  %v1254_v32 = vadd.f32 1.0, %v1253_v18  ;;  %v1246_v39 = vmul.f32 %v2254_v4, %v1245_v11 }
 0x2fd   :  { %vm1257_vm8 = vcmp.lt.f32.partialorder %v1256_v52, 0.0004427343 }
 0x2fe   :  { %v1255_v33 = vmul.f32 %v2256_v2, %v1254_v32 }
 0x2ff   :  { %v2258_v17 = vpop.eup %2257 }
 0x300   :  { %v2260_v51 = vpop.eup %2259  ;;  %v1259_v42 = vadd.f32 1.0, %v2258_v17  ;;  %v1262_v1 = vmul.f32 -0.5, %v2258_v17  ;;  %v1265_v30 = vand.u32 2147483647, %v2258_v17 }
 0x301   :  { %v2262_v59 = vpop.eup %2261  ;;  %v1243_v19 = vmul.f32 0.6931472, %v2260_v51 }
 0x302   :  { %v2264_v43 = vpop.eup %2263  ;;  %2265 = vlog2.f32 %v1259_v42  ;;  %v1268_v62 = vadd.f32 1.0, %v2262_v59  ;;  %v1271_v21 = vmul.f32 -0.5, %v2262_v59  ;;  %v1263_v28 = vadd.f32 1.0, %v1262_v1 }
 0x303   :  { %v1252_v10 = vmul.f32 0.6931472, %v2264_v43  ;;  %v1249_v5 = vsel %vm1248_vm7, %v1246_v39, %v1243_v19  ;;  %v1274_v37 = vand.u32 2147483647, %v2262_v59  ;;  %vm1266_vm9 = vcmp.lt.f32.partialorder %v1265_v30, 0.0004427343 }
 0x304   :  { %2267 = vlog2.f32 %v1268_v62  ;;  %v1272_v24 = vadd.f32 1.0, %v1271_v21  ;;  %v1264_v40 = vmul.f32 %v2258_v17, %v1263_v28  ;;  %v1277_v41 = vmul.f32 %v1249_v5, %v2702_v58 }
 0x305   :  { %v1258_v27 = vsel %vm1257_vm8, %v1255_v33, %v1252_v10  ;;  %vm1275_vm10 = vcmp.lt.f32.partialorder %v1274_v37, 0.0004427343  ;;  %vm1627_vm7 = vcmask 7168  }
 0x306   :  { %v1273_v46 = vmul.f32 %v2262_v59, %v1272_v24  ;;  %v1278_v47 = vmul.f32 %v1258_v27, %v2702_v58  ;;  %v1281_v49 = vsel %vm1229_vm11, %v2776_v14, %v1277_v41  ;;  %v1319_v14 = vld [vmem:[%s2871_s9] sm:$0x3] }
 0x307   :  { %v1322_v63 = vperm.slane %v1319_v14, 1  ;;  %v1605_v27 = vld [vmem:[%s2872_s10] sm:$0x3] }
 0x308   :  { %v2266_v35 = vpop.eup %2265  ;;  %v1282_v29 = vsel %vm1230_vm13, %v2781_v15, %v1278_v47 }
 0x309   :  { %v1261_v38 = vmul.f32 0.6931472, %v2266_v35 }
 0x30a   :  { %v2268_v8 = vpop.eup %2267 }
 0x30b   :  { %v1267_v44 = vsel %vm1266_vm9, %v1264_v40, %v1261_v38  ;;  %v1270_v22 = vmul.f32 0.6931472, %v2268_v8 }
 0x30c   :  { %v1279_v6 = vmul.f32 %v1267_v44, %v2702_v58 }
 0x30d   :  { %v1276_v48 = vsel %vm1275_vm10, %v1273_v46, %v1270_v22 }
 0x30e   :  { %v1283_v53 = vsel %vm1231_vm12, %v2790_v16, %v1279_v6  ;;  %v1280_v54 = vmul.f32 %v1276_v48, %v2702_v58  ;;  %v1321_v16 = vperm.slane %v1319_v14, 0  ;;  %v1607_v48 = vperm.slane %v1605_v27, 0 }
 0x30f   :  { %v1285_v55 = vpack.c.bf16 %v1283_v53, %v1281_v49 }
 0x310   :  { %v1284_v61 = vsel %vm1232_vm14, %v2795_v0, %v1280_v54  ;;  %v1608_v54 = vperm.slane %v1605_v27, 1 }
 0x311   :  { %v1286_v31 = vpack.c.bf16 %v1284_v61, %v1282_v29  ;;  %1493 = vmatmul.bf16.vlgmr.msra.gmra.mxu3 %v1285_v55  ;;  %1521 = vmatmul.bf16.vlgmr.msrb.gmra.mxu1 %v1285_v55 }
 0x313   :  { %1507 = vmatmul.bf16.vlgmr.msrb.gmra.mxu0 %v1286_v31  ;;  %1535 = vmatmul.bf16.vlgmr.msrb.gmra.mxu2 %v1286_v31 }
 0x38e   :  { %v1522_v23 = vpop.f32.mrf.mxu1 }
 0x38f   :  { %v1523_v25 = vadd.f32 %v1522_v23, %v1322_v63 }
 0x390   :  { %v1508_v45 = vpop.f32.mrf.mxu0 }
 0x394   :  { %v1494_v7 = vpop.f32.mrf.mxu3 }
 0x395   :  { %v1495_v3 = vadd.f32 %v1494_v7, %v1321_v16 }
 0x396   :  { %v1536_v50 = vpop.f32.mrf.mxu2  ;;  %v1524_v34 = vpop.f32.mrf.mxu1 }
 0x397   :  { %v2817_v15 = vadd.f32 %v1508_v45, %v1495_v3  ;;  %v2819_v36 = vadd.f32 %v1536_v50, %v1523_v25  ;;  %v1525_v2 = vadd.f32 %v1524_v34, %v1322_v63 }
 0x398   :  { %v1510_v13 = vpop.f32.mrf.mxu0 }
 0x399   :  { %v2822_v0 = vmul.f32 100.0, %v2817_v15  ;;  %v2825_v26 = vmul.f32 100.0, %v2819_v36 }
 0x39b   :  { %v1545_v4 = vmin.f32 %v2822_v0, 20.0  ;;  %v1546_v9 = vmin.f32 %v2825_v26, 20.0  ;;  %vm1549_vm1 = vcmp.gt.f32.partialorder %v2822_v0, 20.0  ;;  %vm1550_vm2 = vcmp.gt.f32.partialorder %v2825_v26, 20.0 }
 0x39c   :  { %v1496_v20 = vpop.f32.mrf.mxu3 }
 0x39d   :  { %v1553_v56 = vmul.f32 1.442695, %v1545_v4  ;;  %v1555_v57 = vmul.f32 1.442695, %v1546_v9  ;;  %v1497_v12 = vadd.f32 %v1496_v20, %v1321_v16 }
 0x39e   :  { %v1538_v17 = vpop.f32.mrf.mxu2 }
 0x39f   :  { %2269 = vpow2.f32 %v1553_v56  ;;  %v2829_v18 = vadd.f32 %v1510_v13, %v1497_v12  ;;  %v2831_v51 = vadd.f32 %v1538_v17, %v1525_v2  ;;  %v2218_v13 = vld [vmem:[#allocation2] ss:$0 sm:$0xff] }
 0x3a0   :  { %2271 = vpow2.f32 %v1555_v57 }
 0x3a1   :  { %v2834_v42 = vmul.f32 100.0, %v2829_v18  ;;  %v2837_v59 = vmul.f32 100.0, %v2831_v51 }
 0x3a3   :  { %v1547_v11 = vmin.f32 %v2834_v42, 20.0  ;;  %v1548_v1 = vmin.f32 %v2837_v59, 20.0  ;;  %vm1551_vm5 = vcmp.gt.f32.partialorder %v2834_v42, 20.0  ;;  %vm1552_vm6 = vcmp.gt.f32.partialorder %v2837_v59, 20.0 }
 0x3a5   :  { %v2270_v43 = vpop.eup %2269  ;;  %v1557_v60 = vmul.f32 1.442695, %v1547_v11  ;;  %v1559_v62 = vmul.f32 1.442695, %v1548_v1 }
 0x3a6   :  { %v2272_v19 = vpop.eup %2271  ;;  %v1561_v32 = vadd.f32 1.0, %v2270_v43  ;;  %v1564_v52 = vmul.f32 -0.5, %v2270_v43  ;;  %v1567_v30 = vand.u32 2147483647, %v2270_v43 }
 0x3a7   :  { %2273 = vpow2.f32 %v1557_v60  ;;  %v1570_v21 = vadd.f32 1.0, %v2272_v19  ;;  %v1573_v39 = vmul.f32 -0.5, %v2272_v19  ;;  %v1576_v24 = vand.u32 2147483647, %v2272_v19 }
 0x3a8   :  { %2275 = vpow2.f32 %v1559_v62  ;;  %v1565_v10 = vadd.f32 1.0, %v1564_v52  ;;  %vm1568_vm15 = vcmp.lt.f32.partialorder %v1567_v30, 0.0004427343 }
 0x3a9   :  { %2277 = vlog2.f32 %v1561_v32  ;;  %v1574_v5 = vadd.f32 1.0, %v1573_v39  ;;  %vm1577_vm0 = vcmp.lt.f32.partialorder %v1576_v24, 0.0004427343 }
 0x3aa   :  { %2279 = vlog2.f32 %v1570_v21  ;;  %v1566_v44 = vmul.f32 %v2270_v43, %v1565_v10 }
 0x3ab   :  { %v1575_v47 = vmul.f32 %v2272_v19, %v1574_v5 }
 0x3ad   :  { %v2274_v28 = vpop.eup %2273 }
 0x3ae   :  { %v2276_v33 = vpop.eup %2275  ;;  %v1579_v35 = vadd.f32 1.0, %v2274_v28  ;;  %v1582_v38 = vmul.f32 -0.5, %v2274_v28  ;;  %v1585_v61 = vand.u32 2147483647, %v2274_v28 }
 0x3af   :  { %v2278_v37 = vpop.eup %2277  ;;  %v1588_v40 = vadd.f32 1.0, %v2276_v33  ;;  %v1591_v22 = vmul.f32 -0.5, %v2276_v33  ;;  %v1594_v23 = vand.u32 2147483647, %v2276_v33 }
 0x3b0   :  { %v2280_v8 = vpop.eup %2279  ;;  %v1563_v41 = vmul.f32 0.6931472, %v2278_v37  ;;  %2281 = vlog2.f32 %v1579_v35  ;;  %v1583_v55 = vadd.f32 1.0, %v1582_v38  ;;  %vm1586_vm3 = vcmp.lt.f32.partialorder %v1585_v61, 0.0004427343 }
 0x3b1   :  { %v1572_v46 = vmul.f32 0.6931472, %v2280_v8  ;;  %2283 = vlog2.f32 %v1588_v40  ;;  %v1592_v31 = vadd.f32 1.0, %v1591_v22  ;;  %vm1595_vm4 = vcmp.lt.f32.partialorder %v1594_v23, 0.0004427343 }
 0x3b2   :  { %v1569_v6 = vsel %vm1568_vm15, %v1566_v44, %v1563_v41  ;;  %v1584_v50 = vmul.f32 %v2274_v28, %v1583_v55 }
 0x3b3   :  { %v1578_v49 = vsel %vm1577_vm0, %v1575_v47, %v1572_v46  ;;  %v1597_v53 = vmul.f32 %v1569_v6, %v2702_v58  ;;  %v1593_v0 = vmul.f32 %v2276_v33, %v1592_v31 }
 0x3b4   :  { %v1598_v29 = vmul.f32 %v1578_v49, %v2702_v58 }
 0x3b5   :  { %v1601_v14 = vsel %vm1549_vm1, %v2817_v15, %v1597_v53 }
 0x3b6   :  { %v2282_v63 = vpop.eup %2281  ;;  %v1602_v16 = vsel %vm1550_vm2, %v2819_v36, %v1598_v29  ;;  %v1611_v45 = vmul.f32 %v1607_v48, %v1601_v14 }
 0x3b7   :  { %v2284_v7 = vpop.eup %2283  ;;  %v1612_v25 = vmul.f32 %v1608_v54, %v1602_v16  ;;  %v1581_v3 = vmul.f32 0.6931472, %v2282_v63 }
 0x3b8   :  { %v1590_v34 = vmul.f32 0.6931472, %v2284_v7 }
 0x3b9   :  { %v1615_v4 = vadd.f32 %v1612_v25, %v1611_v45  ;;  %v1587_v9 = vsel %vm1586_vm3, %v1584_v50, %v1581_v3 }
 0x3ba   :  { %v1596_v20 = vsel %vm1595_vm4, %v1593_v0, %v1590_v34  ;;  %v1599_v26 = vmul.f32 %v1587_v9, %v2702_v58 }
 0x3bb   :  { %1616 = vadd.xlane.f32.xlu0 %v1615_v4  ;;  %v1600_v15 = vmul.f32 %v1596_v20, %v2702_v58 }
 0x3bc   :  { %v1603_v36 = vsel %vm1551_vm5, %v2829_v18, %v1599_v26 }
 0x3bd   :  { %v1604_v56 = vsel %vm1552_vm6, %v2831_v51, %v1600_v15  ;;  %v1613_v2 = vmul.f32 %v1607_v48, %v1603_v36 }
 0x3be   :  { %v1614_v57 = vmul.f32 %v1608_v54, %v1604_v56 }
 0x3c0   :  { %v1618_v12 = vadd.f32 %v1614_v57, %v1613_v2 }
 0x3c3   :  { %1619 = vadd.xlane.f32.xlu0 %v1618_v12 }
 0x42e   :  { %v1617_v17 = vpop.xlane.xlu0 %1616 }
 0x42f   :  { %v1625_v11 = vadd.f32 %v2218_v13, %v1617_v17 }
 0x431   :  { %1628 = vst.msk [vmem:[%s2874_s12] sm:$0xff] %vm1627_vm7, %v1625_v11 }
 0x436   :  { %v1620_v42 = vpop.xlane.xlu0 %1619 }
 0x437   :  { %v1626_v58 = vadd.f32 %v2218_v13, %v1620_v42 }
 0x439   :  { %1629 = vst.msk [vmem:[%s2874_s12 + $0x8] sm:$0xff] %vm1627_vm7, %v1626_v58 }
 0x43a   :  { %1634 = vsyncpa [#allocation4], 1 }
 0x43b   :  { %1635 = vsyncpa [#allocation6], 1 }
 0x43c   :  { %1636 = vsyncpa [#allocation9], 1 }

</bundles_post_ra>
